<compile_context>
chip_gen: v6e
topology: v6e:2x2x1
jax: 0.10.0
libtpu: 0.0.40
codegen_flags: <defaults>
</compile_context>

<pallas_src>
import functools

import jax
import jax.numpy as jnp
from jax.experimental import pallas as pl
from jax.experimental.pallas import tpu as pltpu

_LANE = 128
_VMEM_LIMIT = 48 * 1024 * 1024   # covers tile=2048 double-buffered; safe on v5e/v6e/v7x


def _round_up(x, m):
    return ((x + m - 1) // m) * m


def _choose_tile(n, block):
    """A_hat tile edge (multiple of 128).  Shrinks only for small graphs, or to keep
    >=2 row tiles so the v7x megacore can shard the 'parallel' row axis."""
    tile = min(_round_up(block, _LANE), _round_up(n, _LANE))
    while tile > _LANE and _round_up(n, tile) // tile < 2:
        tile = max(_LANE, ((tile // 2) // _LANE) * _LANE)
    return tile


# --------------------------------------------------------------------------------------
# Kernel 1: feature transform  XW = H @ W   (row-tiled, bf16 operands, f32 MXU accumulate)
# --------------------------------------------------------------------------------------
def _feature_transform_kernel(h_ref, w_ref, out_ref):
    out_ref[...] = jnp.dot(h_ref[...], w_ref[...],
                           preferred_element_type=jnp.float32).astype(out_ref.dtype)


def _feature_transform(h, w_pad, *, tile):
    n_pad, fin = h.shape
    c = w_pad.shape[1]
    return pl.pallas_call(
        _feature_transform_kernel,
        out_shape=jax.ShapeDtypeStruct((n_pad, c), jnp.bfloat16),
        grid_spec=pltpu.PrefetchScalarGridSpec(
            num_scalar_prefetch=0,
            grid=(n_pad // tile,),
            in_specs=[pl.BlockSpec((tile, fin), lambda i: (i, 0)),   # H row tile
                      pl.BlockSpec((fin, c), lambda i: (0, 0))],     # W (resident)
            out_specs=pl.BlockSpec((tile, c), lambda i: (i, 0)),
        ),
        compiler_params=pltpu.CompilerParams(
            dimension_semantics=("parallel",),
            vmem_limit_bytes=_VMEM_LIMIT,
        ),
    )(h, w_pad)


# --------------------------------------------------------------------------------------
# Kernel 2: block-sparse aggregation  out = [relu](A_hat @ XW + b)
#   grid = (row_tiles, max_nonzero_k_tiles).  Scalar-prefetched per-row-tile k-tile ids
#   drive the A_hat / XW index maps; all-zero A_hat tiles are skipped entirely.
# --------------------------------------------------------------------------------------
def _aggregate_kernel(ids_ref, cnt_ref, a_ref, xw_ref, b_ref, out_ref, acc_ref, *,
                      apply_relu):
    i = pl.program_id(0)
    k = pl.program_id(1)
    cnt = cnt_ref[i]

    @pl.when(k == 0)
    def _init():
        acc_ref[...] = jnp.zeros_like(acc_ref)

    @pl.when(k < cnt)
    def _accumulate():
        acc_ref[...] += jnp.dot(a_ref[...], xw_ref[...],
                                preferred_element_type=jnp.float32)

    @pl.when(k == cnt - 1)
    def _finalize():
        h = acc_ref[...] + b_ref[...]
        if apply_relu:
            h = jnp.maximum(h, 0.0)
        out_ref[...] = h.astype(out_ref.dtype)


def _gcn_aggregate(a_pad, xw, b_pad, ids, counts, *, tile, apply_relu,
                   out_dtype=jnp.bfloat16):
    n_pad = a_pad.shape[0]
    c = xw.shape[1]
    nt = n_pad // tile
    mc = ids.shape[1]                       # max nonzero k-tiles over row tiles
    ids_flat = ids.reshape(-1)              # 1-D SMEM prefetch table

    a_map = lambda i, k, ids_r, cnt_r: (i, ids_r[i * mc + k])
    xw_map = lambda i, k, ids_r, cnt_r: (ids_r[i * mc + k], 0)
    b_map = lambda i, k, ids_r, cnt_r: (0, 0)
    o_map = lambda i, k, ids_r, cnt_r: (i, 0)

    kernel = functools.partial(_aggregate_kernel, apply_relu=apply_relu)
    return pl.pallas_call(
        kernel,
        out_shape=jax.ShapeDtypeStruct((n_pad, c), out_dtype),
        grid_spec=pltpu.PrefetchScalarGridSpec(
            num_scalar_prefetch=2,
            grid=(nt, mc),
            in_specs=[
                pl.BlockSpec((tile, tile), a_map),    # A_hat tile (data-dependent k)
                pl.BlockSpec((tile, c), xw_map),      # XW k-tile (precomputed, bf16)
                pl.BlockSpec((1, c), b_map),          # bias (resident)
            ],
            out_specs=pl.BlockSpec((tile, c), o_map),
            scratch_shapes=[pltpu.VMEM((tile, c), jnp.float32)],
        ),
        compiler_params=pltpu.CompilerParams(
            dimension_semantics=("parallel", "arbitrary"),
            vmem_limit_bytes=_VMEM_LIMIT,
        ),
    )(ids_flat, counts, a_pad, xw, b_pad)


# --------------------------------------------------------------------------------------
# One-time (per graph) preprocessing: padded bf16 A_hat + block-sparsity metadata.
# --------------------------------------------------------------------------------------
def prepare_graph(a_hat, *, block=2048):
    n = a_hat.shape[0]
    tile = _choose_tile(n, block)
    n_pad = _round_up(n, tile)
    nt = n_pad // tile
    a_pad = jnp.zeros((n_pad, n_pad), jnp.bfloat16).at[:n, :n].set(
        a_hat.astype(jnp.bfloat16))

    blk_mass = jnp.abs(a_pad.astype(jnp.float32)).reshape(nt, tile, nt, tile).sum(
        axis=(1, 3))
    nz = blk_mass > 0.0                                              # (nt, nt)
    counts = jnp.maximum(nz.sum(axis=1), 1).astype(jnp.int32)        # >=1 so out written
    order = jnp.argsort(jnp.where(nz, 0, 1), axis=1)                 # nonzero ids first
    max_count = int(jnp.max(counts))
    col = jnp.minimum(jnp.arange(max_count)[None, :], counts[:, None] - 1)
    ids = jnp.take_along_axis(order, col, axis=1).astype(jnp.int32)  # (nt, max_count)
    return a_pad, ids, counts, tile


# --------------------------------------------------------------------------------------
# Forward pass (eval mode). Drug nodes are the first `num_drugs` rows of x.
# --------------------------------------------------------------------------------------
@functools.partial(jax.jit, static_argnames=("num_drugs", "tile"))
def gcn_forward(a_pad, ids, counts, x, w1, b1, w2, b2, predictor, *, num_drugs, tile):
    n_pad = a_pad.shape[0]
    n, f = x.shape
    hidden = w1.shape[1]
    c = _round_up(hidden, _LANE)             # lane-dense padded hidden width
    bf = jnp.bfloat16

    # Cheap O(N*F) parameter/feature padding. Padded rows/lanes stay exactly zero
    # through W/bias/ReLU, so real outputs are unaffected.
    x_p = jnp.zeros((n_pad, f), bf).at[:n, :].set(x.astype(bf))
    w1_p = jnp.zeros((f, c), bf).at[:, :hidden].set(w1.astype(bf))
    b1_p = jnp.zeros((1, c), jnp.float32).at[:, :hidden].set(
        b1.reshape(1, hidden).astype(jnp.float32))
    w2_p = jnp.zeros((c, c), bf).at[:hidden, :hidden].set(w2.astype(bf))
    b2_p = jnp.zeros((1, c), jnp.float32).at[:, :hidden].set(
        b2.reshape(1, hidden).astype(jnp.float32))

    # conv1 + ReLU   (dropout: eval-mode identity)
    xw1 = _feature_transform(x_p, w1_p, tile=tile)
    h1 = _gcn_aggregate(a_pad, xw1, b1_p, ids, counts, tile=tile, apply_relu=True)
    # conv2
    xw2 = _feature_transform(h1, w2_p, tile=tile)
    h2 = _gcn_aggregate(a_pad, xw2, b2_p, ids, counts, tile=tile, apply_relu=False)

    # Bilinear drug-drug scores (tiny: num_drugs x num_drugs) -> plain XLA.
    xd = h2[:num_drugs, :hidden]
    s = jnp.dot(xd, predictor.astype(bf), preferred_element_type=jnp.float32).astype(bf)
    return jnp.dot(s, xd.T, preferred_element_type=jnp.float32)


def build_normalized_adjacency(edge_index, num_nodes):
    """Dense D^{-1/2}(A+I)D^{-1/2} matching PyG GCNConv's gcn_norm (per-edge summation)."""
    src, dst = edge_index[0], edge_index[1]
    m = jnp.zeros((num_nodes, num_nodes), jnp.float32)
    m = m.at[dst, src].add(1.0)                      # message src -> dst (duplicates sum)
    m = m + jnp.eye(num_nodes, dtype=jnp.float32)    # self-loops
    deg = m.sum(axis=1)
    dis = jnp.where(deg > 0, 1.0 / jnp.sqrt(deg), 0.0)
    return dis[:, None] * m * dis[None, :]


def _reference_forward(a_hat, x, w1, b1, w2, b2, predictor, num_drugs):
    """Plain-JAX reference mirroring the kernel's bf16-operand / f32-accumulate math."""
    bf, f32 = jnp.bfloat16, jnp.float32
    a = a_hat.astype(bf)
    xw1 = jnp.dot(x.astype(bf), w1.astype(bf), preferred_element_type=f32).astype(bf)
    h1 = jnp.maximum(jnp.dot(a, xw1, preferred_element_type=f32) + b1, 0.0).astype(bf)
    xw2 = jnp.dot(h1, w2.astype(bf), preferred_element_type=f32).astype(bf)
    h2 = (jnp.dot(a, xw2, preferred_element_type=f32) + b2).astype(bf)
    xd = h2[:num_drugs]
    s = jnp.dot(xd, predictor.astype(bf), preferred_element_type=f32).astype(bf)
    return jnp.dot(s, xd.T, preferred_element_type=f32)


if __name__ == "__main__":
    key = jax.random.PRNGKey(0)
    (k_x, k_w1, k_b1, k_w2, k_b2, k_p,
     k_e1s, k_e1d, k_e2s, k_e2d, k_e3s, k_e3d) = jax.random.split(key, 12)

    NUM_NODE_FEATURES = 8
    HIDDEN = 16
    NUM_DRUGS = 4

    # Parameters (GCNConv weights/biases + bilinear predictor), shared by both cases.
    w1 = jax.random.normal(k_w1, (NUM_NODE_FEATURES, HIDDEN), jnp.float32) * 0.1
    b1 = jax.random.normal(k_b1, (1, HIDDEN), jnp.float32) * 0.01
    w2 = jax.random.normal(k_w2, (HIDDEN, HIDDEN), jnp.float32) * 0.1
    b2 = jax.random.normal(k_b2, (1, HIDDEN), jnp.float32) * 0.01
    predictor = jax.random.normal(k_p, (HIDDEN, HIDDEN), jnp.float32)

    def run_case(x, edge_index):
        n = x.shape[0]
        a_hat = build_normalized_adjacency(edge_index, n)
        a_pad, ids, counts, tile = prepare_graph(a_hat)     # once per graph, not per call
        scores = gcn_forward(a_pad, ids, counts, x, w1, b1, w2, b2, predictor,
                             num_drugs=NUM_DRUGS, tile=tile)
        scores = jax.block_until_ready(scores)
        ref = _reference_forward(a_hat, x, w1, b1, w2, b2, predictor, NUM_DRUGS)
        assert scores.shape == (NUM_DRUGS, NUM_DRUGS)
        assert jnp.allclose(scores, ref, atol=2e-3, rtol=2e-2), (
            f"max abs err {jnp.max(jnp.abs(scores - ref))}")

    # Case 1: 300-node "community" graph -> 3x3 grid of 128-tiles, with some all-zero
    # A_hat blocks, exercising the block-sparse skip path (counts differ per row tile).
    N1 = 300
    x1 = jax.random.normal(k_x, (N1, NUM_NODE_FEATURES), jnp.float32)
    src = jnp.concatenate([jax.random.randint(k_e1s, (60,), 0, 100),
                           jax.random.randint(k_e2s, (40,), 130, 250),
                           jax.random.randint(k_e3s, (20,), 130, 250)])
    dst = jnp.concatenate([jax.random.randint(k_e1d, (60,), 0, 100),
                           jax.random.randint(k_e2d, (40,), 130, 250),
                           jax.random.randint(k_e3d, (20,), 0, 100)])
    run_case(x1, jnp.stack([src, dst], axis=0))

    # Case 2: tiny 16-node graph (single-tile path).
    N2 = 16
    x2 = x1[:N2]
    src2 = jax.random.randint(k_e1s, (32,), 0, N2)
    dst2 = jax.random.randint(k_e1d, (32,), 0, N2)
    run_case(x2, jnp.stack([src2, dst2], axis=0))

    print("KERNEL_OK")
</pallas_src>

<mosaic_0001>
module attributes {stable_mosaic.version = 11 : i64} {
  func.func @_feature_transform_kernel(%arg0: i32, %arg1: memref<128x8xbf16, #tpu.memory_space<vmem>>, %arg2: memref<8x128xbf16, #tpu.memory_space<vmem>>, %arg3: memref<128x128xbf16, #tpu.memory_space<vmem>>) attributes {dimension_semantics = [#tpu.dimension_semantics<parallel>], iteration_bounds = array<i64: 3>, scalar_prefetch = 0 : i64, scratch_operands = 0 : i64, tpu.core_type = #tpu.core_type<tc>, window_params = [{transform_indices = @transform_0, window_bounds = array<i64: 128, 8>}, {pipeline_mode = #tpu.pipeline_mode<synchronous>, transform_indices = @transform_1, window_bounds = array<i64: 8, 128>}, {transform_indices = @transform_2, window_bounds = array<i64: 128, 128>}]} {
    %c0 = arith.constant 0 : index
    %c0_0 = arith.constant 0 : index
    %0 = vector.load %arg1[%c0, %c0_0] : memref<128x8xbf16, #tpu.memory_space<vmem>>, vector<128x8xbf16>
    %c0_1 = arith.constant 0 : index
    %c0_2 = arith.constant 0 : index
    %1 = vector.load %arg2[%c0_1, %c0_2] : memref<8x128xbf16, #tpu.memory_space<vmem>>, vector<8x128xbf16>
    %cst = arith.constant dense<0.000000e+00> : vector<128x128xf32>
    %2 = tpu.matmul %0, %1, %cst {dimension_numbers = #tpu.dot_dimension_numbers<[1], [0], [0], [1], [0, 0, 1, 1], [], []>} : vector<128x8xbf16>, vector<8x128xbf16>, vector<128x128xf32> -> vector<128x128xf32>
    %3 = arith.truncf %2 : vector<128x128xf32> to vector<128x128xbf16>
    %c0_3 = arith.constant 0 : index
    %c0_4 = arith.constant 0 : index
    %4 = vector.load %arg3[%c0_3, %c0_4] : memref<128x128xbf16, #tpu.memory_space<vmem>>, vector<128x128xbf16>
    tpu.vector_store %arg3[%c0_3, %c0_4], %3 {strides = array<i32>} : memref<128x128xbf16, #tpu.memory_space<vmem>>, vector<128x128xbf16>,
    return
  }
  func.func @transform_0(%arg0: i32) -> (i32, i32) {
    %c0_i32 = arith.constant 0 : i32
    %c0_i32_0 = arith.constant 0 : i32
    return %arg0, %c0_i32 : i32, i32
  }
  func.func @transform_1(%arg0: i32) -> (i32, i32) {
    %c0_i32 = arith.constant 0 : i32
    %c0_i32_0 = arith.constant 0 : i32
    %c0_i32_1 = arith.constant 0 : i32
    return %c0_i32, %c0_i32_0 : i32, i32
  }
  func.func @transform_2(%arg0: i32) -> (i32, i32) {
    %c0_i32 = arith.constant 0 : i32
    %c0_i32_0 = arith.constant 0 : i32
    return %arg0, %c0_i32 : i32, i32
  }
}

module attributes {stable_mosaic.version = 11 : i64} {
  func.func @_aggregate_kernel(%arg0: i32, %arg1: i32, %arg2: memref<6xi32, #tpu.memory_space<smem>>, %arg3: memref<3xi32, #tpu.memory_space<smem>>, %arg4: memref<128x128xbf16, #tpu.memory_space<vmem>>, %arg5: memref<128x128xbf16, #tpu.memory_space<vmem>>, %arg6: memref<1x128xf32, #tpu.memory_space<vmem>>, %arg7: memref<128x128xbf16, #tpu.memory_space<vmem>>, %arg8: memref<128x128xf32, #tpu.memory_space<vmem>>) attributes {dimension_semantics = [#tpu.dimension_semantics<parallel>, #tpu.dimension_semantics<arbitrary>], iteration_bounds = array<i64: 3, 2>, scalar_prefetch = 2 : i64, scratch_operands = 1 : i64, tpu.core_type = #tpu.core_type<tc>, window_params = [{transform_indices = @transform_0, window_bounds = array<i64: 128, 128>}, {transform_indices = @transform_1, window_bounds = array<i64: 128, 128>}, {pipeline_mode = #tpu.pipeline_mode<synchronous>, transform_indices = @transform_2, window_bounds = array<i64: 1, 128>}, {transform_indices = @transform_3, window_bounds = array<i64: 128, 128>}]} {
    %0 = arith.index_cast %arg0 : i32 to index
    %1 = memref.load %arg3[%0] : memref<3xi32, #tpu.memory_space<smem>>
    %c0_i32 = arith.constant 0 : i32
    %2 = arith.cmpi eq, %arg1, %c0_i32 : i32
    %3 = arith.extui %2 : i1 to i32
    %c0_i32_0 = arith.constant 0 : i32
    %4 = arith.cmpi ne, %3, %c0_i32_0 : i32
    scf.if %4 {
      %cst = arith.constant 0.000000e+00 : f32
      %12 = vector.broadcast %cst : f32 to vector<128x128xf32>
      %c0 = arith.constant 0 : index
      %c0_3 = arith.constant 0 : index
      %13 = vector.load %arg8[%c0, %c0_3] : memref<128x128xf32, #tpu.memory_space<vmem>>, vector<128x128xf32>
      tpu.vector_store %arg8[%c0, %c0_3], %12 {strides = array<i32>} : memref<128x128xf32, #tpu.memory_space<vmem>>, vector<128x128xf32>,
    } else {
    }
    %5 = arith.cmpi slt, %arg1, %1 : i32
    %6 = arith.extui %5 : i1 to i32
    %c0_i32_1 = arith.constant 0 : i32
    %7 = arith.cmpi ne, %6, %c0_i32_1 : i32
    scf.if %7 {
      %c0 = arith.constant 0 : index
      %c0_3 = arith.constant 0 : index
      %12 = vector.load %arg8[%c0, %c0_3] : memref<128x128xf32, #tpu.memory_space<vmem>>, vector<128x128xf32>
      %c0_4 = arith.constant 0 : index
      %c0_5 = arith.constant 0 : index
      %13 = vector.load %arg4[%c0_4, %c0_5] : memref<128x128xbf16, #tpu.memory_space<vmem>>, vector<128x128xbf16>
      %c0_6 = arith.constant 0 : index
      %c0_7 = arith.constant 0 : index
      %14 = vector.load %arg5[%c0_6, %c0_7] : memref<128x128xbf16, #tpu.memory_space<vmem>>, vector<128x128xbf16>
      %cst = arith.constant dense<0.000000e+00> : vector<128x128xf32>
      %15 = tpu.matmul %13, %14, %cst {dimension_numbers = #tpu.dot_dimension_numbers<[1], [0], [0], [1], [0, 0, 1, 1], [], []>} : vector<128x128xbf16>, vector<128x128xbf16>, vector<128x128xf32> -> vector<128x128xf32>
      %16 = arith.addf %12, %15 : vector<128x128xf32>
      %c0_8 = arith.constant 0 : index
      %c0_9 = arith.constant 0 : index
      %17 = vector.load %arg8[%c0_8, %c0_9] : memref<128x128xf32, #tpu.memory_space<vmem>>, vector<128x128xf32>
      tpu.vector_store %arg8[%c0_8, %c0_9], %16 {strides = array<i32>} : memref<128x128xf32, #tpu.memory_space<vmem>>, vector<128x128xf32>,
    } else {
    }
    %c1_i32 = arith.constant 1 : i32
    %8 = arith.subi %1, %c1_i32 : i32
    %9 = arith.cmpi eq, %arg1, %8 : i32
    %10 = arith.extui %9 : i1 to i32
    %c0_i32_2 = arith.constant 0 : i32
    %11 = arith.cmpi ne, %10, %c0_i32_2 : i32
    scf.if %11 {
      %c0 = arith.constant 0 : index
      %c0_3 = arith.constant 0 : index
      %12 = vector.load %arg8[%c0, %c0_3] : memref<128x128xf32, #tpu.memory_space<vmem>>, vector<128x128xf32>
      %c0_4 = arith.constant 0 : index
      %c0_5 = arith.constant 0 : index
      %13 = vector.load %arg6[%c0_4, %c0_5] : memref<1x128xf32, #tpu.memory_space<vmem>>, vector<1x128xf32>
      %14 = vector.broadcast %13 : vector<1x128xf32> to vector<128x128xf32>
      %15 = arith.addf %12, %14 : vector<128x128xf32>
      %cst = arith.constant 0.000000e+00 : f32
      %16 = vector.broadcast %cst : f32 to vector<128x128xf32>
      %17 = arith.maximumf %15, %16 : vector<128x128xf32>
      %18 = arith.truncf %17 : vector<128x128xf32> to vector<128x128xbf16>
      %c0_6 = arith.constant 0 : index
      %c0_7 = arith.constant 0 : index
      %19 = vector.load %arg7[%c0_6, %c0_7] : memref<128x128xbf16, #tpu.memory_space<vmem>>, vector<128x128xbf16>
      tpu.vector_store %arg7[%c0_6, %c0_7], %18 {strides = array<i32>} : memref<128x128xbf16, #tpu.memory_space<vmem>>, vector<128x128xbf16>,
    } else {
    }
    return
  }
  func.func @transform_0(%arg0: i32, %arg1: i32, %arg2: memref<6xi32, #tpu.memory_space<smem>>, %arg3: memref<3xi32, #tpu.memory_space<smem>>) -> (i32, i32) {
    %c2_i32 = arith.constant 2 : i32
    %0 = arith.muli %arg0, %c2_i32 : i32
    %1 = arith.addi %0, %arg1 : i32
    %2 = arith.index_cast %1 : i32 to index
    %3 = memref.load %arg2[%2] : memref<6xi32, #tpu.memory_space<smem>>
    %c0_i32 = arith.constant 0 : i32
    return %arg0, %3 : i32, i32
  }
  func.func @transform_1(%arg0: i32, %arg1: i32, %arg2: memref<6xi32, #tpu.memory_space<smem>>, %arg3: memref<3xi32, #tpu.memory_space<smem>>) -> (i32, i32) {
    %c2_i32 = arith.constant 2 : i32
    %0 = arith.muli %arg0, %c2_i32 : i32
    %1 = arith.addi %0, %arg1 : i32
    %2 = arith.index_cast %1 : i32 to index
    %3 = memref.load %arg2[%2] : memref<6xi32, #tpu.memory_space<smem>>
    %c0_i32 = arith.constant 0 : i32
    %c0_i32_0 = arith.constant 0 : i32
    return %3, %c0_i32 : i32, i32
  }
  func.func @transform_2(%arg0: i32, %arg1: i32, %arg2: memref<6xi32, #tpu.memory_space<smem>>, %arg3: memref<3xi32, #tpu.memory_space<smem>>) -> (i32, i32) {
    %c0_i32 = arith.constant 0 : i32
    %c0_i32_0 = arith.constant 0 : i32
    %c0_i32_1 = arith.constant 0 : i32
    return %c0_i32, %c0_i32_0 : i32, i32
  }
  func.func @transform_3(%arg0: i32, %arg1: i32, %arg2: memref<6xi32, #tpu.memory_space<smem>>, %arg3: memref<3xi32, #tpu.memory_space<smem>>) -> (i32, i32) {
    %c0_i32 = arith.constant 0 : i32
    %c0_i32_0 = arith.constant 0 : i32
    return %arg0, %c0_i32 : i32, i32
  }
}

module attributes {stable_mosaic.version = 11 : i64} {
  func.func @_feature_transform_kernel(%arg0: i32, %arg1: memref<128x128xbf16, #tpu.memory_space<vmem>>, %arg2: memref<128x128xbf16, #tpu.memory_space<vmem>>, %arg3: memref<128x128xbf16, #tpu.memory_space<vmem>>) attributes {dimension_semantics = [#tpu.dimension_semantics<parallel>], iteration_bounds = array<i64: 3>, scalar_prefetch = 0 : i64, scratch_operands = 0 : i64, tpu.core_type = #tpu.core_type<tc>, window_params = [{transform_indices = @transform_0, window_bounds = array<i64: 128, 128>}, {pipeline_mode = #tpu.pipeline_mode<synchronous>, transform_indices = @transform_1, window_bounds = array<i64: 128, 128>}, {transform_indices = @transform_2, window_bounds = array<i64: 128, 128>}]} {
    %c0 = arith.constant 0 : index
    %c0_0 = arith.constant 0 : index
    %0 = vector.load %arg1[%c0, %c0_0] : memref<128x128xbf16, #tpu.memory_space<vmem>>, vector<128x128xbf16>
    %c0_1 = arith.constant 0 : index
    %c0_2 = arith.constant 0 : index
    %1 = vector.load %arg2[%c0_1, %c0_2] : memref<128x128xbf16, #tpu.memory_space<vmem>>, vector<128x128xbf16>
    %cst = arith.constant dense<0.000000e+00> : vector<128x128xf32>
    %2 = tpu.matmul %0, %1, %cst {dimension_numbers = #tpu.dot_dimension_numbers<[1], [0], [0], [1], [0, 0, 1, 1], [], []>} : vector<128x128xbf16>, vector<128x128xbf16>, vector<128x128xf32> -> vector<128x128xf32>
    %3 = arith.truncf %2 : vector<128x128xf32> to vector<128x128xbf16>
    %c0_3 = arith.constant 0 : index
    %c0_4 = arith.constant 0 : index
    %4 = vector.load %arg3[%c0_3, %c0_4] : memref<128x128xbf16, #tpu.memory_space<vmem>>, vector<128x128xbf16>
    tpu.vector_store %arg3[%c0_3, %c0_4], %3 {strides = array<i32>} : memref<128x128xbf16, #tpu.memory_space<vmem>>, vector<128x128xbf16>,
    return
  }
  func.func @transform_0(%arg0: i32) -> (i32, i32) {
    %c0_i32 = arith.constant 0 : i32
    %c0_i32_0 = arith.constant 0 : i32
    return %arg0, %c0_i32 : i32, i32
  }
  func.func @transform_1(%arg0: i32) -> (i32, i32) {
    %c0_i32 = arith.constant 0 : i32
    %c0_i32_0 = arith.constant 0 : i32
    %c0_i32_1 = arith.constant 0 : i32
    return %c0_i32, %c0_i32_0 : i32, i32
  }
  func.func @transform_2(%arg0: i32) -> (i32, i32) {
    %c0_i32 = arith.constant 0 : i32
    %c0_i32_0 = arith.constant 0 : i32
    return %arg0, %c0_i32 : i32, i32
  }
}

module attributes {stable_mosaic.version = 11 : i64} {
  func.func @_aggregate_kernel(%arg0: i32, %arg1: i32, %arg2: memref<6xi32, #tpu.memory_space<smem>>, %arg3: memref<3xi32, #tpu.memory_space<smem>>, %arg4: memref<128x128xbf16, #tpu.memory_space<vmem>>, %arg5: memref<128x128xbf16, #tpu.memory_space<vmem>>, %arg6: memref<1x128xf32, #tpu.memory_space<vmem>>, %arg7: memref<128x128xbf16, #tpu.memory_space<vmem>>, %arg8: memref<128x128xf32, #tpu.memory_space<vmem>>) attributes {dimension_semantics = [#tpu.dimension_semantics<parallel>, #tpu.dimension_semantics<arbitrary>], iteration_bounds = array<i64: 3, 2>, scalar_prefetch = 2 : i64, scratch_operands = 1 : i64, tpu.core_type = #tpu.core_type<tc>, window_params = [{transform_indices = @transform_0, window_bounds = array<i64: 128, 128>}, {transform_indices = @transform_1, window_bounds = array<i64: 128, 128>}, {pipeline_mode = #tpu.pipeline_mode<synchronous>, transform_indices = @transform_2, window_bounds = array<i64: 1, 128>}, {transform_indices = @transform_3, window_bounds = array<i64: 128, 128>}]} {
    %0 = arith.index_cast %arg0 : i32 to index
    %1 = memref.load %arg3[%0] : memref<3xi32, #tpu.memory_space<smem>>
    %c0_i32 = arith.constant 0 : i32
    %2 = arith.cmpi eq, %arg1, %c0_i32 : i32
    %3 = arith.extui %2 : i1 to i32
    %c0_i32_0 = arith.constant 0 : i32
    %4 = arith.cmpi ne, %3, %c0_i32_0 : i32
    scf.if %4 {
      %cst = arith.constant 0.000000e+00 : f32
      %12 = vector.broadcast %cst : f32 to vector<128x128xf32>
      %c0 = arith.constant 0 : index
      %c0_3 = arith.constant 0 : index
      %13 = vector.load %arg8[%c0, %c0_3] : memref<128x128xf32, #tpu.memory_space<vmem>>, vector<128x128xf32>
      tpu.vector_store %arg8[%c0, %c0_3], %12 {strides = array<i32>} : memref<128x128xf32, #tpu.memory_space<vmem>>, vector<128x128xf32>,
    } else {
    }
    %5 = arith.cmpi slt, %arg1, %1 : i32
    %6 = arith.extui %5 : i1 to i32
    %c0_i32_1 = arith.constant 0 : i32
    %7 = arith.cmpi ne, %6, %c0_i32_1 : i32
    scf.if %7 {
      %c0 = arith.constant 0 : index
      %c0_3 = arith.constant 0 : index
      %12 = vector.load %arg8[%c0, %c0_3] : memref<128x128xf32, #tpu.memory_space<vmem>>, vector<128x128xf32>
      %c0_4 = arith.constant 0 : index
      %c0_5 = arith.constant 0 : index
      %13 = vector.load %arg4[%c0_4, %c0_5] : memref<128x128xbf16, #tpu.memory_space<vmem>>, vector<128x128xbf16>
      %c0_6 = arith.constant 0 : index
      %c0_7 = arith.constant 0 : index
      %14 = vector.load %arg5[%c0_6, %c0_7] : memref<128x128xbf16, #tpu.memory_space<vmem>>, vector<128x128xbf16>
      %cst = arith.constant dense<0.000000e+00> : vector<128x128xf32>
      %15 = tpu.matmul %13, %14, %cst {dimension_numbers = #tpu.dot_dimension_numbers<[1], [0], [0], [1], [0, 0, 1, 1], [], []>} : vector<128x128xbf16>, vector<128x128xbf16>, vector<128x128xf32> -> vector<128x128xf32>
      %16 = arith.addf %12, %15 : vector<128x128xf32>
      %c0_8 = arith.constant 0 : index
      %c0_9 = arith.constant 0 : index
      %17 = vector.load %arg8[%c0_8, %c0_9] : memref<128x128xf32, #tpu.memory_space<vmem>>, vector<128x128xf32>
      tpu.vector_store %arg8[%c0_8, %c0_9], %16 {strides = array<i32>} : memref<128x128xf32, #tpu.memory_space<vmem>>, vector<128x128xf32>,
    } else {
    }
    %c1_i32 = arith.constant 1 : i32
    %8 = arith.subi %1, %c1_i32 : i32
    %9 = arith.cmpi eq, %arg1, %8 : i32
    %10 = arith.extui %9 : i1 to i32
    %c0_i32_2 = arith.constant 0 : i32
    %11 = arith.cmpi ne, %10, %c0_i32_2 : i32
    scf.if %11 {
      %c0 = arith.constant 0 : index
      %c0_3 = arith.constant 0 : index
      %12 = vector.load %arg8[%c0, %c0_3] : memref<128x128xf32, #tpu.memory_space<vmem>>, vector<128x128xf32>
      %c0_4 = arith.constant 0 : index
      %c0_5 = arith.constant 0 : index
      %13 = vector.load %arg6[%c0_4, %c0_5] : memref<1x128xf32, #tpu.memory_space<vmem>>, vector<1x128xf32>
      %14 = vector.broadcast %13 : vector<1x128xf32> to vector<128x128xf32>
      %15 = arith.addf %12, %14 : vector<128x128xf32>
      %16 = arith.truncf %15 : vector<128x128xf32> to vector<128x128xbf16>
      %c0_6 = arith.constant 0 : index
      %c0_7 = arith.constant 0 : index
      %17 = vector.load %arg7[%c0_6, %c0_7] : memref<128x128xbf16, #tpu.memory_space<vmem>>, vector<128x128xbf16>
      tpu.vector_store %arg7[%c0_6, %c0_7], %16 {strides = array<i32>} : memref<128x128xbf16, #tpu.memory_space<vmem>>, vector<128x128xbf16>,
    } else {
    }
    return
  }
  func.func @transform_0(%arg0: i32, %arg1: i32, %arg2: memref<6xi32, #tpu.memory_space<smem>>, %arg3: memref<3xi32, #tpu.memory_space<smem>>) -> (i32, i32) {
    %c2_i32 = arith.constant 2 : i32
    %0 = arith.muli %arg0, %c2_i32 : i32
    %1 = arith.addi %0, %arg1 : i32
    %2 = arith.index_cast %1 : i32 to index
    %3 = memref.load %arg2[%2] : memref<6xi32, #tpu.memory_space<smem>>
    %c0_i32 = arith.constant 0 : i32
    return %arg0, %3 : i32, i32
  }
  func.func @transform_1(%arg0: i32, %arg1: i32, %arg2: memref<6xi32, #tpu.memory_space<smem>>, %arg3: memref<3xi32, #tpu.memory_space<smem>>) -> (i32, i32) {
    %c2_i32 = arith.constant 2 : i32
    %0 = arith.muli %arg0, %c2_i32 : i32
    %1 = arith.addi %0, %arg1 : i32
    %2 = arith.index_cast %1 : i32 to index
    %3 = memref.load %arg2[%2] : memref<6xi32, #tpu.memory_space<smem>>
    %c0_i32 = arith.constant 0 : i32
    %c0_i32_0 = arith.constant 0 : i32
    return %3, %c0_i32 : i32, i32
  }
  func.func @transform_2(%arg0: i32, %arg1: i32, %arg2: memref<6xi32, #tpu.memory_space<smem>>, %arg3: memref<3xi32, #tpu.memory_space<smem>>) -> (i32, i32) {
    %c0_i32 = arith.constant 0 : i32
    %c0_i32_0 = arith.constant 0 : i32
    %c0_i32_1 = arith.constant 0 : i32
    return %c0_i32, %c0_i32_0 : i32, i32
  }
  func.func @transform_3(%arg0: i32, %arg1: i32, %arg2: memref<6xi32, #tpu.memory_space<smem>>, %arg3: memref<3xi32, #tpu.memory_space<smem>>) -> (i32, i32) {
    %c0_i32 = arith.constant 0 : i32
    %c0_i32_0 = arith.constant 0 : i32
    return %arg0, %c0_i32 : i32, i32
  }
}

</mosaic_0001>

<bundles_post_ra>
// kernel: gcn_forward.4
= control target key start
LH: loop header
LB: loop body
LE: loop exit
PB: predicated region body
PF: predicated region fallthrough
CT: control target
= control target key end

     0   :  { %s643_s9 = smov 0   ;;  %s671_s0 = inlined_call_operand.vmem [shape: bf16[384,8], index: 0, kind: input, shape index: {}]   ;;  %s672_s1 = inlined_call_operand.vmem [shape: bf16[8,128], index: 1, kind: input, shape index: {}]   ;;  %s673_s2 = inlined_call_operand.vmem [shape: bf16[384,128], index: 2, kind: output, shape index: {}]  }
   0x1 LB: > { %s467_s10 = sadd.s32 4294967295, %s626_s9   ;;  %p471_p0 = scmp.ge.s32.totalorder %s626_s9, 1  ;;  %s626_s9 = sphi %s643_s9, %s12_s9  }
   0x2   : > { %p113_p1 = scmp.lt.s32.totalorder %s626_s9, 4 }
   0x4   : > { %p114_p2 = pnand %p471_p0, %p113_p1 }
   0x5   : > { %s472_s13 = sshll.u32 (!%p114_p2), %s467_s10, 4 }
   0x6   : > { %117 = sbr.rel (%p114_p2) target bundleno = 227 (0xe3), region = 28  ;;  %p136_p3 = scmp.lt.s32.totalorder (!%p114_p2), %s472_s13, 47 }
   0xb   : > { %v164_v0 = vld [vmem:[%s672_s1] sm:$0xf]  ;;  %vm230_vm0 = vcmask 1043456   ;;  %s675_s13 = smov (!%p136_p3, %s472_s13), 47  ;;  %vm205_vm1 = vcmask 64512  }
   0xc   : > { %602 = vmatprep.subr.msk.bf16.mxu0 %vm230_vm0, %v164_v0  ;;  %603 = vmatprep.subr.msk.bf16.mxu1 %vm230_vm0, %v164_v0  ;;  %v232_v1 = vsel %vm230_vm0, %v164_v0, 0  ;;  %s473_s14 = sshll.u32 %s675_s13, 2 }
   0xd   : > { %583 = vmatpush3.bf16.msra.mxu0 %v232_v1  ;;  %601 = vmatpush3.bf16.msra.mxu1 %v232_v1  ;;  %s139_s17 = scalar_lea.vmem %s671_s0, %s473_s14  ;;  %s145_s20 = scalar_lea.vmem %s673_s2, %s473_s14 }
   0xe   : > { %v612_v2 = vld [vmem:[%s139_s17] sm:$0xff]   ;;  %v614_v4 = vld [vmem:[%s139_s17 + $0x8] sm:$0xff]   ;;  %v616_v6 = vld [vmem:[%s139_s17 + $0x10] sm:$0xff]  }
   0xf   : > { %v613_v3 = vld [vmem:[%s139_s17 + $0x20] sm:$0xff]   ;;  %584 = vmatprep.mubr.msk.bf16.mxu0 %vm205_vm1, %v612_v2  ;;  %v615_v5 = vld [vmem:[%s139_s17 + $0x28] sm:$0xff]   ;;  %v617_v7 = vld [vmem:[%s139_s17 + $0x30] sm:$0xff]  }
  0x10   : > { %592 = vmatprep.mubr.msk.bf16.mxu1 %vm205_vm1, %v613_v3  ;;  %585 = vmatmul.mubr.msk.bf16.vlgmr.msra.gmra.mxu0 %vm205_vm1, %v614_v4  ;;  %v618_v8 = vld [vmem:[%s139_s17 + $0x18] sm:$0xff]  }
  0x11   : > { %593 = vmatmul.mubr.msk.bf16.vlgmr.msra.gmra.mxu1 %vm205_vm1, %v615_v5  ;;  %588 = vmatprep.mubr.msk.bf16.mxu0 %vm205_vm1, %v616_v6  ;;  %v619_v9 = vld [vmem:[%s139_s17 + $0x38] sm:$0xff]  }
  0x12   : > { %596 = vmatprep.mubr.msk.bf16.mxu1 %vm205_vm1, %v617_v7 }
  0x18   : > { %589 = vmatmul.mubr.msk.bf16.gmra.mxu0 %vm205_vm1, %v618_v8 }
  0x19   : > { %597 = vmatmul.mubr.msk.bf16.gmra.mxu1 %vm205_vm1, %v619_v9 }
  0xd0   : > { %v586_v10 = vpop.f32.mrf.mxu0 }
  0xd1   : > { %v594_v11 = vpop.f32.mrf.mxu1 }
  0xd2   : > { %v268_v12 = vpop.f32.mrf.mxu0 }
  0xd3   : > { %v300_v13 = vpop.f32.mrf.mxu1 }
  0xd4   : > { %v587_v14 = vpop.f32.mrf.mxu0 }
  0xd5   : > { %v534_v15 = vpack.c.bf16 %v587_v14, %v586_v10  ;;  %v595_v16 = vpop.f32.mrf.mxu1 }
  0xd6   : > { %v554_v17 = vpack.c.bf16 %v595_v16, %v594_v11  ;;  %v271_v18 = vpop.f32.mrf.mxu0 }
  0xd7   : > { %566 = vst [vmem:[%s145_s20 + $0x8] sm:$0xff] %v534_v15   ;;  %v529_v19 = vpack.c.bf16 %v271_v18, %v268_v12  ;;  %v303_v20 = vpop.f32.mrf.mxu1 }
  0xd8   : > { %570 = vst [vmem:[%s145_s20 + $0x28] sm:$0xff] %v554_v17   ;;  %v549_v21 = vpack.c.bf16 %v303_v20, %v300_v13  ;;  %v590_v22 = vpop.f32.mrf.mxu0 }
  0xd9   : > { %530 = vst [vmem:[%s145_s20] sm:$0xff] %v529_v19   ;;  %v598_v23 = vpop.f32.mrf.mxu1 }
  0xda   : > { %569 = vst [vmem:[%s145_s20 + $0x20] sm:$0xff] %v549_v21   ;;  %v284_v24 = vpop.f32.mrf.mxu0 }
  0xdb   : > { %v316_v25 = vpop.f32.mrf.mxu1 }
  0xdc   : > { %v591_v26 = vpop.f32.mrf.mxu0 }
  0xdd   : > { %v544_v27 = vpack.c.bf16 %v591_v26, %v590_v22  ;;  %v599_v28 = vpop.f32.mrf.mxu1 }
  0xde   : > { %v564_v29 = vpack.c.bf16 %v599_v28, %v598_v23  ;;  %v287_v30 = vpop.f32.mrf.mxu0 }
  0xdf   : > { %568 = vst [vmem:[%s145_s20 + $0x18] sm:$0xff] %v544_v27   ;;  %v539_v31 = vpack.c.bf16 %v287_v30, %v284_v24  ;;  %v319_v32 = vpop.f32.mrf.mxu1 }
  0xe0   : > { %572 = vst [vmem:[%s145_s20 + $0x38] sm:$0xff] %v564_v29   ;;  %v559_v33 = vpack.c.bf16 %v319_v32, %v316_v25 }
  0xe1   : > { %567 = vst [vmem:[%s145_s20 + $0x10] sm:$0xff] %v539_v31  }
  0xe2   : > { %571 = vst [vmem:[%s145_s20 + $0x30] sm:$0xff] %v559_v33  }
  0xe3 PF: > { %s12_s9 = sadd.s32 1, %s626_s9  }
  0xe4   : > { %p9_p4 = scmp.ge.s32.totalorder %s12_s9, 5  }
  0xe6   :  { %11 = sbr.rel (!%p9_p4) target bundleno = 1 (0x1), region = 58 }

// kernel: gcn_forward.5
= control target key start
LH: loop header
LB: loop body
LE: loop exit
PB: predicated region body
PF: predicated region fallthrough
CT: control target
= control target key end

     0   :  { %s1423_s0 = inlined_call_operand.vmem [shape: s32[6], index: 0, kind: input, shape index: {}]   ;;  %s1424_s2 = inlined_call_operand.vmem [shape: bf16[384,384], index: 2, kind: input, shape index: {}]   ;;  %s1425_s3 = inlined_call_operand.vmem [shape: bf16[384,128], index: 3, kind: input, shape index: {}]   ;;  %s1426_s4 = inlined_call_operand.vmem [shape: f32[1,128], index: 4, kind: input, shape index: {}]   ;;  %s1427_s5 = inlined_call_operand.vmem [shape: bf16[384,128], index: 5, kind: output, shape index: {}]   ;;  %s1428_s1 = inlined_call_operand.vmem [shape: s32[3], index: 1, kind: input, shape index: {}]  }
   0x1   :  { %s10_s20 = sshll.u32 %s1423_s0, 4  ;;  %s14_s23 = sshll.u32 %s1428_s1, 4  ;;  %s11_s20 = int_to_ptr.vmem [resolvable:$true] %s10_s20  ;;  %s15_s23 = int_to_ptr.vmem [resolvable:$true] %s14_s23 }
   0x2   :  { %s1149_s24 = scalar_lea.vmem %s11_s20, 16  ;;  %p1154_p1 = scmp.lt.s32.totalorder %s11_s20, %s11_s20 }
   0x3   :  { %p1150_p0 = scmp.ne.s32.totalorder %s11_s20, %s1149_s24  ;;  %p1155_p2 = scmp.lt.s32.totalorder %s1149_s24, %s1149_s24 }
   0x5   :  { %p1156_p3 = por %p1155_p2, %p1154_p1 }
   0x7   :  { %p1157_p4 = pnand %p1156_p3, %p1150_p0 }
   0x9   :  { %1160 = shalt.err (!%p1157_p4)  }
   0xa   :  { %s1231_s25 = smov [#allocation4]   ;;  %s1161_s26 = scalar_lea.vmem %s15_s23, 16 }
   0xb   :  { %13 = dma.vmem_to_smem %s11_s20, 16, %s1231_s25, [#allocation3] }
   0xc   :  { %p1162_p5 = scmp.ne.s32.totalorder %s15_s23, %s1161_s26  ;;  %p1166_p6 = scmp.lt.s32.totalorder %s15_s23, %s15_s23 }
   0xd   :  { %p1167_p7 = scmp.lt.s32.totalorder %s1161_s26, %s1161_s26 }
   0xf   :  { %p1168_p8 = por %p1167_p7, %p1166_p6 }
  0x11   :  { %p1169_p9 = pnand %p1168_p8, %p1162_p5 }
  0x13   :  { %1172 = shalt.err (!%p1169_p9)  }
  0x14   :  { %s1232_s0 = smov [#allocation5]  }
  0x15   :  { %17 = dma.vmem_to_smem %s15_s23, 16, %s1232_s0, [#allocation3] }
  0x16   :  { %1201 = dma.done.wait [#allocation3], 32 }
  0x17   :  { %1202 = vsyncadd [#allocation3], 4294967264 }
  0x18   :  { %19 = sfence }
  0x19   :  { %s1270_s1 = smov 0   ;;  %s1272_s27 = smov 0  }
  0x1a   :  { %s1274_s28 = smov 0   ;;  %s1276_s29 = smov 0  }
  0x1b   :  { %s1278_s30 = smov 0   ;;  %s1280_s6 = smov 0  }
  0x1c   :  { %s1282_s7 = smov 0  }
  0x1d LB: > { %s34_s8 = sadd.s32 1, %s1221_s30  ;;  %s37_s9 = sadd.s32 1, %s1225_s6  ;;  %s1229_s7 = sphi %s1282_s7, %s25_s7   ;;  %s1225_s6 = sphi %s1280_s6, %s1434_s6   ;;  %s1221_s30 = sphi %s1278_s30, %s1433_s30   ;;  %s1217_s29 = sphi %s1276_s29, %s1432_s29   ;;  %s1213_s28 = sphi %s1274_s28, %s1431_s28   ;;  %s1209_s27 = sphi %s1272_s27, %s1430_s27   ;;  %s1205_s1 = sphi %s1270_s1, %s1429_s1  }
  0x1e   : > { %p35_p10 = scmp.ge.s32.totalorder %s34_s8, 2  ;;  %s889_s10 = sshll.u32 %s1225_s6, 1 }
  0x1f   : > { %s42_s11 = sadd.s32 %s1221_s30, %s889_s10  ;;  %p59_p11 = scmp.ne.s32.totalorder %s1209_s27, %s1205_s1 }
  0x20   : > { %s1436_s9 = smov (!%p35_p10, %s37_s9), %s1225_s6  ;;  %p60_p13 = scmp.eq.s32.totalorder %s1229_s7, 0 }
  0x21   : > { %p39_p12 = scmp.ge.s32.totalorder %s1436_s9, 3  ;;  %s1438_s8 = smov (%p35_p10, %s34_s8), 0 }
  0x22   : > { %p61_p0 = por %p60_p13, %p59_p11  ;;  %s43_s12 = sld [smem:[#allocation4 + %s42_s11]] }
  0x23   : > { %s1440_s9 = smov (%p39_p12, %s1436_s9), 0  ;;  %s52_s19 = sadd.s32 1, %s1209_s27 }
  0x24   : > { %s890_s13 = sshll.u32 %s1440_s9, 1  ;;  %s47_s16 = ssub.s32 %s1225_s6, %s1440_s9 }
  0x25   : > { %s45_s14 = sadd.s32 %s890_s13, %s1438_s8  ;;  %p894_p2 = scmp.ge.s32.totalorder %s1229_s7, 6 }
  0x26   : > { %s46_s15 = sld [smem:[#allocation4 + %s45_s14]] }
  0x2c   : > { %s48_s17 = ssub.s32 %s43_s12, %s46_s15  ;;  %167 = sbr.rel (%p894_p2) target bundleno = 69 (0x45), region = 20 }
  0x2d   : > { %s49_s18 = sor.u32 %s48_s17, %s47_s16 }
  0x2e   : > { %p50_p1 = scmp.eq.s32.totalorder %s49_s18, 0 }
  0x30   : > { %s1323_s20 = scalar_select %p50_p1, %s1209_s27, %s52_s19  }
  0x31   : > { %170 = sbr.rel (!%p61_p0) target bundleno = 69 (0x45), region = 24  ;;  %s177_s21 = sld [smem:[#allocation4 + %s42_s11]] (%p61_p0) }
  0x32   : > { %s172_s22 = sand.u32 (%p61_p0), 1, %s1209_s27   ;;  %s1073_s23 = smul.u32 (%p61_p0), 48, %s1225_s6 }
  0x33   : > { %s895_s24 = sshll.u32 (%p61_p0), %s172_s22, 6 }
  0x34   : > { %s174_s11 = scalar_lea.vmem (%p61_p0), [#allocation6], %s895_s24 }
  0x37   : > { %s180_s25 = sadd.s32 %s1073_s23, %s177_s21 }
  0x38   : > { %s899_s26 = sshll.u32 %s180_s25, 2 }
  0x39   : > { %s1331_s12 = scalar_lea.vmem %s1424_s2, %s899_s26 }
  0x3a   : > { %v199_v0 = vld [vmem:[%s1331_s12] sm:$0xf]  ;;  %v201_v1 = vld [vmem:[%s1331_s12 + $0xc] sm:$0xf]  ;;  %v203_v2 = vld [vmem:[%s1331_s12 + $0x18] sm:$0xf] }
  0x3b   : > { %200 = vst [vmem:[%s174_s11] sm:$0xf] %v199_v0  ;;  %202 = vst [vmem:[%s174_s11 + $0x4] sm:$0xf] %v201_v1  ;;  %v205_v3 = vld [vmem:[%s1331_s12 + $0x24] sm:$0xf] }
  0x3c   : > { %204 = vst [vmem:[%s174_s11 + $0x8] sm:$0xf] %v203_v2  ;;  %v207_v4 = vld [vmem:[%s1331_s12 + $0x30] sm:$0xf]  ;;  %v209_v5 = vld [vmem:[%s1331_s12 + $0x3c] sm:$0xf] }
  0x3d   : > { %206 = vst [vmem:[%s174_s11 + $0xc] sm:$0xf] %v205_v3  ;;  %208 = vst [vmem:[%s174_s11 + $0x10] sm:$0xf] %v207_v4  ;;  %v211_v6 = vld [vmem:[%s1331_s12 + $0x48] sm:$0xf] }
  0x3e   : > { %210 = vst [vmem:[%s174_s11 + $0x14] sm:$0xf] %v209_v5  ;;  %v213_v7 = vld [vmem:[%s1331_s12 + $0x54] sm:$0xf]  ;;  %v215_v8 = vld [vmem:[%s1331_s12 + $0x60] sm:$0xf] }
  0x3f   : > { %212 = vst [vmem:[%s174_s11 + $0x18] sm:$0xf] %v211_v6  ;;  %214 = vst [vmem:[%s174_s11 + $0x1c] sm:$0xf] %v213_v7  ;;  %v217_v9 = vld [vmem:[%s1331_s12 + $0x6c] sm:$0xf] }
  0x40   : > { %216 = vst [vmem:[%s174_s11 + $0x20] sm:$0xf] %v215_v8  ;;  %v219_v10 = vld [vmem:[%s1331_s12 + $0x78] sm:$0xf]  ;;  %v221_v11 = vld [vmem:[%s1331_s12 + $0x84] sm:$0xf] }
  0x41   : > { %218 = vst [vmem:[%s174_s11 + $0x24] sm:$0xf] %v217_v9  ;;  %220 = vst [vmem:[%s174_s11 + $0x28] sm:$0xf] %v219_v10  ;;  %v223_v12 = vld [vmem:[%s1331_s12 + $0x90] sm:$0xf] }
  0x42   : > { %222 = vst [vmem:[%s174_s11 + $0x2c] sm:$0xf] %v221_v11  ;;  %v225_v13 = vld [vmem:[%s1331_s12 + $0x9c] sm:$0xf]  ;;  %v227_v14 = vld [vmem:[%s1331_s12 + $0xa8] sm:$0xf] }
  0x43   : > { %224 = vst [vmem:[%s174_s11 + $0x30] sm:$0xf] %v223_v12  ;;  %226 = vst [vmem:[%s174_s11 + $0x34] sm:$0xf] %v225_v13  ;;  %v229_v15 = vld [vmem:[%s1331_s12 + $0xb4] sm:$0xf] }
  0x44   : > { %228 = vst [vmem:[%s174_s11 + $0x38] sm:$0xf] %v227_v14  ;;  %230 = vst [vmem:[%s174_s11 + $0x3c] sm:$0xf] %v229_v15 }
  0x45 PF: > { %p900_p3 = scmp.ge.s32.totalorder %s1229_s7, 1  ;;  %p300_p4 = scmp.lt.s32.totalorder %s1229_s7, 7 }
  0x47   : > { %p301_p5 = pnand %p900_p3, %p300_p4 }
  0x48   : > { %s307_s13 = sand.u32 (!%p301_p5), 1, %s1205_s1   ;;  %s902_s14 = sshll.u32 (!%p301_p5), %s1217_s29, 1 }
  0x49   : > { %304 = sbr.rel (%p301_p5) target bundleno = 370 (0x172), region = 69  ;;  %s901_s15 = sshll.u32 (!%p301_p5), %s307_s13, 6 }
  0x4a   : > { %s343_s16 = sadd.s32 (!%p301_p5), %s1213_s28, %s902_s14  ;;  %s905_s18 = sshll.u32 (!%p301_p5), %s1217_s29, 4 }
  0x4b   : > { %s344_s17 = sld [smem:[#allocation4 + %s343_s16]] (!%p301_p5)  ;;  %p355_p6 = scmp.lt.s32.totalorder (!%p301_p5), %s905_s18, 47 }
  0x4c   : > { %s1356_s19 = sld [smem:[#allocation5 + %s1217_s29]] (!%p301_p5)  ;;  %s1368_s12 = scalar_lea.vmem (!%p301_p5), [#allocation6], %s901_s15 }
  0x4d   : > { %p907_p8 = scmp.ne.s32.totalorder (!%p301_p5), %s1213_s28, 0 }
  0x4e   : > { %s1442_s18 = smov (!%p355_p6, %s905_s18), 47 }
  0x4f   : > { %s906_s22 = sshll.u32 %s1442_s18, 2 }
  0x50   : > { %s1361_s25 = scalar_lea.vmem %s1427_s5, %s906_s22 }
  0x51   : > { %s903_s21 = sshll.u32 %s344_s17, 4 }
  0x52   : > { %p346_p7 = scmp.lt.s32.totalorder %s903_s21, 47  ;;  %365 = sbr.rel (%p907_p8) target bundleno = 96 (0x60), region = 77 }
  0x54   : > { %s1444_s21 = smov (!%p346_p7, %s903_s21), 47 }
  0x55   : > { %s904_s26 = sshll.u32 %s1444_s21, 2 }
  0x56   : > { %s1366_s10 = scalar_lea.vmem %s1425_s3, %s904_s26 }
  0x57   : > { %v1233_v16 = vmov 0.0  }
  0x58   : > { %366 = vst [vmem:[#allocation2 + $0x30] sm:$0xff] %v1233_v16  ;;  %367 = vst [vmem:[#allocation2] sm:$0xff] %v1233_v16 }
  0x59   : > { %368 = vst [vmem:[#allocation2 + $0x58] sm:$0xff] %v1233_v16  ;;  %369 = vst [vmem:[#allocation2 + $0x18] sm:$0xff] %v1233_v16 }
  0x5a   : > { %370 = vst [vmem:[#allocation2 + $0x50] sm:$0xff] %v1233_v16  ;;  %371 = vst [vmem:[#allocation2 + $0x68] sm:$0xff] %v1233_v16 }
  0x5b   : > { %372 = vst [vmem:[#allocation2 + $0x8] sm:$0xff] %v1233_v16  ;;  %373 = vst [vmem:[#allocation2 + $0x48] sm:$0xff] %v1233_v16 }
  0x5c   : > { %374 = vst [vmem:[#allocation2 + $0x40] sm:$0xff] %v1233_v16  ;;  %375 = vst [vmem:[#allocation2 + $0x20] sm:$0xff] %v1233_v16 }
  0x5d   : > { %376 = vst [vmem:[#allocation2 + $0x10] sm:$0xff] %v1233_v16  ;;  %377 = vst [vmem:[#allocation2 + $0x38] sm:$0xff] %v1233_v16 }
  0x5e   : > { %378 = vst [vmem:[#allocation2 + $0x60] sm:$0xff] %v1233_v16  ;;  %379 = vst [vmem:[#allocation2 + $0x70] sm:$0xff] %v1233_v16 }
  0x5f   : > { %380 = vst [vmem:[#allocation2 + $0x78] sm:$0xff] %v1233_v16  ;;  %381 = vst [vmem:[#allocation2 + $0x28] sm:$0xff] %v1233_v16 }
  0x60 PF: > { %p908_p9 = scmp.ge.s32.totalorder %s1213_s28, %s1356_s19 }
  0x62   : > { %385 = sbr.rel (%p908_p9) target bundleno = 346 (0x15a), region = 81 }
  0x67   : > { %v1133_v17 = vld [vmem:[%s1366_s10 + $0x38] sm:$0xff]   ;;  %v1134_v18 = vld [vmem:[%s1366_s10 + $0x30] sm:$0xff]   ;;  %v1135_v19 = vld [vmem:[%s1366_s10 + $0x28] sm:$0xff]  }
  0x68   : > { %1025 = vmatprep.subr.bf16.mxu0 %v1133_v17  ;;  %1057 = vmatprep.subr.bf16.mxu1 %v1133_v17  ;;  %v1136_v20 = vld [vmem:[%s1366_s10 + $0x20] sm:$0xff]   ;;  %v1137_v23 = vld [vmem:[%s1366_s10 + $0x18] sm:$0xff]   ;;  %v1138_v24 = vld [vmem:[%s1366_s10 + $0x10] sm:$0xff]  }
  0x69   : > { %1026 = vmatpush3.bf16.msra.mxu0 %v1133_v17  ;;  %1065 = vmatpush3.bf16.msra.mxu1 %v1133_v17  ;;  %v1141_v21 = vld [vmem:[%s1368_s12] sm:$0xff]   ;;  %v1139_v25 = vld [vmem:[%s1366_s10 + $0x8] sm:$0xff]   ;;  %v1145_v29 = vld [vmem:[%s1368_s12 + $0x10] sm:$0xff]  }
  0x6a   : > { %1027 = vmatprep.subr.bf16.mxu0 %v1134_v18  ;;  %1058 = vmatprep.subr.bf16.mxu1 %v1134_v18  ;;  %v1142_v22 = vld [vmem:[%s1368_s12 + $0x20] sm:$0xff]   ;;  %v1143_v27 = vld [vmem:[%s1368_s12 + $0x8] sm:$0xff]   ;;  %v1146_v30 = vld [vmem:[%s1368_s12 + $0x30] sm:$0xff]  }
  0x6b   : > { %1041 = vmatprep.mubr.bf16.mxu0 %v1141_v21  ;;  %1049 = vmatprep.mubr.bf16.mxu1 %v1142_v22  ;;  %v1140_v26 = vld [vmem:[%s1366_s10] sm:$0xff]   ;;  %v1144_v28 = vld [vmem:[%s1368_s12 + $0x28] sm:$0xff]   ;;  %v1147_v31 = vld [vmem:[%s1368_s12 + $0x18] sm:$0xff]  }
  0x6c   : > { %v1148_v32 = vld [vmem:[%s1368_s12 + $0x38] sm:$0xff]   ;;  %v396_v34 = vld [vmem:[#allocation2 + $0x10] sm:$0xff]  ;;  %v394_v38 = vld [vmem:[#allocation2 + $0x40] sm:$0xff] }
  0x6d   : > { %1028 = vmatpush3.bf16.msra.mxu0 %v1134_v18  ;;  %1066 = vmatpush3.bf16.msra.mxu1 %v1134_v18  ;;  %v388_v33 = vld [vmem:[#allocation2 + $0x58] sm:$0xff]  ;;  %v386_v37 = vld [vmem:[#allocation2 + $0x30] sm:$0xff]  ;;  %v387_v49 = vld [vmem:[#allocation2] sm:$0xff] }
  0x6e   : > { %1029 = vmatprep.subr.bf16.mxu0 %v1135_v19  ;;  %1059 = vmatprep.subr.bf16.mxu1 %v1135_v19  ;;  %v389_v43 = vld [vmem:[#allocation2 + $0x18] sm:$0xff]  ;;  %v395_v50 = vld [vmem:[#allocation2 + $0x20] sm:$0xff]  ;;  %v392_v55 = vld [vmem:[#allocation2 + $0x8] sm:$0xff] }
  0x6f   : > { %v397_v44 = vld [vmem:[#allocation2 + $0x38] sm:$0xff]  ;;  %v390_v61 = vld [vmem:[#allocation2 + $0x50] sm:$0xff]  ;;  %v398_v62 = vld [vmem:[#allocation2 + $0x60] sm:$0xff] }
  0x70   : > { %v400_v56 = vld [vmem:[#allocation2 + $0x78] sm:$0xff]  ;;  %v393_v3 = vld [vmem:[#allocation2 + $0x48] sm:$0xff]  ;;  %v399_v10 = vld [vmem:[#allocation2 + $0x70] sm:$0xff] }
  0x71   : > { %1030 = vmatpush3.bf16.msra.mxu0 %v1135_v19  ;;  %1067 = vmatpush3.bf16.msra.mxu1 %v1135_v19  ;;  %v401_v4 = vld [vmem:[#allocation2 + $0x28] sm:$0xff] }
  0x72   : > { %1031 = vmatprep.subr.bf16.mxu0 %v1136_v20  ;;  %1060 = vmatprep.subr.bf16.mxu1 %v1136_v20  ;;  %v391_v9 = vld [vmem:[#allocation2 + $0x68] sm:$0xff] }
  0x75   : > { %1032 = vmatpush3.bf16.msra.mxu0 %v1136_v20  ;;  %1068 = vmatpush3.bf16.msra.mxu1 %v1136_v20 }
  0x76   : > { %1033 = vmatprep.subr.bf16.mxu0 %v1137_v23  ;;  %1061 = vmatprep.subr.bf16.mxu1 %v1137_v23 }
  0x79   : > { %1034 = vmatpush3.bf16.msra.mxu0 %v1137_v23  ;;  %1069 = vmatpush3.bf16.msra.mxu1 %v1137_v23 }
  0x7a   : > { %1035 = vmatprep.subr.bf16.mxu0 %v1138_v24  ;;  %1062 = vmatprep.subr.bf16.mxu1 %v1138_v24 }
  0x7d   : > { %1036 = vmatpush3.bf16.msra.mxu0 %v1138_v24  ;;  %1070 = vmatpush3.bf16.msra.mxu1 %v1138_v24 }
  0x7e   : > { %1037 = vmatprep.subr.bf16.mxu0 %v1139_v25  ;;  %1063 = vmatprep.subr.bf16.mxu1 %v1139_v25 }
  0x81   : > { %1038 = vmatpush3.bf16.msra.mxu0 %v1139_v25  ;;  %1071 = vmatpush3.bf16.msra.mxu1 %v1139_v25 }
  0x82   : > { %1039 = vmatprep.subr.bf16.mxu0 %v1140_v26  ;;  %1064 = vmatprep.subr.bf16.mxu1 %v1140_v26 }
  0x85   : > { %1040 = vmatpush3.bf16.msra.mxu0 %v1140_v26  ;;  %1072 = vmatpush3.bf16.msra.mxu1 %v1140_v26 }
  0x88   : > { %1042 = vmatmul.mubr.bf16.vlgmr.msra.gmra.mxu0 %v1143_v27  ;;  %1050 = vmatmul.mubr.bf16.vlgmr.msra.gmra.mxu1 %v1144_v28 }
  0x89   : > { %1045 = vmatprep.mubr.bf16.mxu0 %v1145_v29  ;;  %1053 = vmatprep.mubr.bf16.mxu1 %v1146_v30 }
  0x90   : > { %1046 = vmatmul.mubr.bf16.gmra.mxu0 %v1147_v31  ;;  %1054 = vmatmul.mubr.bf16.gmra.mxu1 %v1148_v32 }
 0x148   : > { %v1043_v35 = vpop.f32.mrf.mxu0  ;;  %v1051_v36 = vpop.f32.mrf.mxu1 }
 0x149   : > { %v629_v39 = vadd.f32 %v1043_v35, %v388_v33  ;;  %v637_v40 = vadd.f32 %v1051_v36, %v396_v34 }
 0x14a   : > { %v564_v41 = vpop.f32.mrf.mxu0  ;;  %v596_v42 = vpop.f32.mrf.mxu1 }
 0x14b   : > { %645 = vst [vmem:[#allocation2 + $0x58] sm:$0xff] %v629_v39  ;;  %653 = vst [vmem:[#allocation2 + $0x10] sm:$0xff] %v637_v40  ;;  %v627_v45 = vadd.f32 %v564_v41, %v386_v37  ;;  %v635_v46 = vadd.f32 %v596_v42, %v394_v38 }
 0x14c   : > { %v1044_v47 = vpop.f32.mrf.mxu0  ;;  %v1052_v48 = vpop.f32.mrf.mxu1 }
 0x14d   : > { %643 = vst [vmem:[#allocation2 + $0x30] sm:$0xff] %v627_v45  ;;  %651 = vst [vmem:[#allocation2 + $0x40] sm:$0xff] %v635_v46  ;;  %v630_v51 = vadd.f32 %v1044_v47, %v389_v43  ;;  %v638_v52 = vadd.f32 %v1052_v48, %v397_v44 }
 0x14e   : > { %v567_v53 = vpop.f32.mrf.mxu0  ;;  %v599_v54 = vpop.f32.mrf.mxu1 }
 0x14f   : > { %646 = vst [vmem:[#allocation2 + $0x18] sm:$0xff] %v630_v51  ;;  %654 = vst [vmem:[#allocation2 + $0x38] sm:$0xff] %v638_v52  ;;  %v628_v57 = vadd.f32 %v567_v53, %v387_v49  ;;  %v636_v58 = vadd.f32 %v599_v54, %v395_v50 }
 0x150   : > { %v1047_v59 = vpop.f32.mrf.mxu0  ;;  %v1055_v60 = vpop.f32.mrf.mxu1 }
 0x151   : > { %644 = vst [vmem:[#allocation2] sm:$0xff] %v628_v57  ;;  %652 = vst [vmem:[#allocation2 + $0x20] sm:$0xff] %v636_v58  ;;  %v633_v63 = vadd.f32 %v1047_v59, %v392_v55  ;;  %v641_v0 = vadd.f32 %v1055_v60, %v400_v56 }
 0x152   : > { %v580_v1 = vpop.f32.mrf.mxu0  ;;  %v612_v2 = vpop.f32.mrf.mxu1 }
 0x153   : > { %649 = vst [vmem:[#allocation2 + $0x8] sm:$0xff] %v633_v63  ;;  %657 = vst [vmem:[#allocation2 + $0x78] sm:$0xff] %v641_v0  ;;  %v631_v5 = vadd.f32 %v580_v1, %v390_v61  ;;  %v639_v6 = vadd.f32 %v612_v2, %v398_v62 }
 0x154   : > { %v1048_v7 = vpop.f32.mrf.mxu0  ;;  %v1056_v8 = vpop.f32.mrf.mxu1 }
 0x155   : > { %647 = vst [vmem:[#allocation2 + $0x50] sm:$0xff] %v631_v5  ;;  %655 = vst [vmem:[#allocation2 + $0x60] sm:$0xff] %v639_v6  ;;  %v634_v11 = vadd.f32 %v1048_v7, %v393_v3  ;;  %v642_v12 = vadd.f32 %v1056_v8, %v401_v4 }
 0x156   : > { %v583_v13 = vpop.f32.mrf.mxu0  ;;  %v615_v14 = vpop.f32.mrf.mxu1 }
 0x157   : > { %650 = vst [vmem:[#allocation2 + $0x48] sm:$0xff] %v634_v11  ;;  %658 = vst [vmem:[#allocation2 + $0x28] sm:$0xff] %v642_v12  ;;  %v632_v15 = vadd.f32 %v583_v13, %v391_v9  ;;  %v640_v16 = vadd.f32 %v615_v14, %v399_v10 }
 0x159   : > { %648 = vst [vmem:[#allocation2 + $0x68] sm:$0xff] %v632_v15  ;;  %656 = vst [vmem:[#allocation2 + $0x70] sm:$0xff] %v640_v16 }
 0x15a PF: > { %s925_s29 = sadd.s32 4294967295, %s1356_s19 }
 0x15b   : > { %p926_p10 = scmp.ne.s32.totalorder %s1213_s28, %s925_s29 }
 0x15d   : > { %663 = sbr.rel (%p926_p10) target bundleno = 370 (0x172), region = 85 }
 0x162   : > { %v664_v17 = vld [vmem:[#allocation2 + $0x30] sm:$0xff]  ;;  %v665_v18 = vld [vmem:[#allocation2] sm:$0xff]  ;;  %v666_v22 = vld [vmem:[#allocation2 + $0x58] sm:$0xff] }
 0x163   : > { %v927_v19 = vld [vmem:[%s1426_s4] ss:$0 sm:$0xff]  ;;  %v667_v23 = vld [vmem:[#allocation2 + $0x18] sm:$0xff]  ;;  %v668_v24 = vld [vmem:[#allocation2 + $0x50] sm:$0xff] }
 0x164   : > { %v687_v20 = vadd.f32 %v927_v19, %v664_v17  ;;  %v688_v21 = vadd.f32 %v927_v19, %v665_v18  ;;  %v689_v25 = vadd.f32 %v927_v19, %v666_v22  ;;  %v690_v26 = vadd.f32 %v927_v19, %v667_v23  ;;  %v669_v27 = vld [vmem:[#allocation2 + $0x68] sm:$0xff]  ;;  %v672_v35 = vld [vmem:[#allocation2 + $0x40] sm:$0xff]  ;;  %v674_v37 = vld [vmem:[#allocation2 + $0x10] sm:$0xff] }
 0x165   : > { %v691_v28 = vadd.f32 %v927_v19, %v668_v24  ;;  %v670_v29 = vld [vmem:[#allocation2 + $0x8] sm:$0xff]  ;;  %v692_v33 = vadd.f32 %v927_v19, %v669_v27  ;;  %v673_v36 = vld [vmem:[#allocation2 + $0x20] sm:$0xff]  ;;  %v675_v42 = vld [vmem:[#allocation2 + $0x38] sm:$0xff]  ;;  %v695_v47 = vadd.f32 %v927_v19, %v672_v35  ;;  %v697_v52 = vadd.f32 %v927_v19, %v674_v37 }
 0x166   : > { %v671_v30 = vld [vmem:[#allocation2 + $0x48] sm:$0xff]  ;;  %v703_v31 = vmax.f32 %v687_v20, 0.0  ;;  %v704_v32 = vmax.f32 %v688_v21, 0.0  ;;  %v693_v34 = vadd.f32 %v927_v19, %v670_v29  ;;  %v705_v38 = vmax.f32 %v689_v25, 0.0  ;;  %v676_v43 = vld [vmem:[#allocation2 + $0x60] sm:$0xff]  ;;  %v677_v48 = vld [vmem:[#allocation2 + $0x70] sm:$0xff] }
 0x167   : > { %v706_v39 = vmax.f32 %v690_v26, 0.0  ;;  %v707_v40 = vmax.f32 %v691_v28, 0.0  ;;  %v694_v41 = vadd.f32 %v927_v19, %v671_v30  ;;  %v708_v45 = vmax.f32 %v692_v33, 0.0  ;;  %v678_v53 = vld [vmem:[#allocation2 + $0x78] sm:$0xff]  ;;  %v679_v54 = vld [vmem:[#allocation2 + $0x28] sm:$0xff] }
 0x168   : > { %v965_v44 = vpack.c.bf16 %v704_v32, %v703_v31  ;;  %v709_v46 = vmax.f32 %v693_v34, 0.0  ;;  %v696_v51 = vadd.f32 %v927_v19, %v673_v36  ;;  %v711_v56 = vmax.f32 %v695_v47, 0.0 }
 0x169   : > { %v970_v49 = vpack.c.bf16 %v706_v39, %v705_v38  ;;  %v710_v50 = vmax.f32 %v694_v41, 0.0  ;;  %v975_v55 = vpack.c.bf16 %v708_v45, %v707_v40  ;;  %v698_v57 = vadd.f32 %v927_v19, %v675_v42 }
 0x16a   : > { %966 = vst [vmem:[%s1361_s25] sm:$0xff] %v965_v44   ;;  %v699_v58 = vadd.f32 %v927_v19, %v676_v43  ;;  %v712_v60 = vmax.f32 %v696_v51, 0.0  ;;  %v713_v61 = vmax.f32 %v697_v52, 0.0  ;;  %v700_v62 = vadd.f32 %v927_v19, %v677_v48 }
 0x16b   : > { %1002 = vst [vmem:[%s1361_s25 + $0x8] sm:$0xff] %v970_v49   ;;  %v980_v59 = vpack.c.bf16 %v710_v50, %v709_v46  ;;  %1003 = vst [vmem:[%s1361_s25 + $0x10] sm:$0xff] %v975_v55   ;;  %v714_v63 = vmax.f32 %v698_v57, 0.0  ;;  %v701_v1 = vadd.f32 %v927_v19, %v678_v53  ;;  %v702_v2 = vadd.f32 %v927_v19, %v679_v54 }
 0x16c   : > { %v715_v0 = vmax.f32 %v699_v58, 0.0  ;;  %v985_v3 = vpack.c.bf16 %v712_v60, %v711_v56  ;;  %v716_v4 = vmax.f32 %v700_v62, 0.0 }
 0x16d   : > { %1004 = vst [vmem:[%s1361_s25 + $0x18] sm:$0xff] %v980_v59   ;;  %v990_v5 = vpack.c.bf16 %v714_v63, %v713_v61  ;;  %v717_v6 = vmax.f32 %v701_v1, 0.0  ;;  %v718_v7 = vmax.f32 %v702_v2, 0.0 }
 0x16e   : > { %1005 = vst [vmem:[%s1361_s25 + $0x20] sm:$0xff] %v985_v3   ;;  %v995_v8 = vpack.c.bf16 %v716_v4, %v715_v0 }
 0x16f   : > { %1006 = vst [vmem:[%s1361_s25 + $0x28] sm:$0xff] %v990_v5   ;;  %v1000_v9 = vpack.c.bf16 %v718_v7, %v717_v6 }
 0x170   : > { %1007 = vst [vmem:[%s1361_s25 + $0x30] sm:$0xff] %v995_v8  }
 0x171   : > { %1008 = vst [vmem:[%s1361_s25 + $0x38] sm:$0xff] %v1000_v9  }
 0x172 PF: > { %s25_s7 = sadd.s32 1, %s1229_s7   ;;  %s1429_s1 = smov %s1209_s27 }
 0x173   : > { %p22_p11 = scmp.ge.s32.totalorder %s25_s7, 8   ;;  %s1430_s27 = smov %s1323_s20 }
 0x174   : > { %s1431_s28 = smov %s1221_s30  ;;  %s1432_s29 = smov %s1225_s6 }
 0x175   : > { %s1433_s30 = smov %s1438_s8  ;;  %s1434_s6 = smov %s1440_s9 }
 0x176   :  { %24 = sbr.rel (!%p22_p11) target bundleno = 29 (0x1d), region = 123 }

// kernel: gcn_forward.6
= control target key start
LH: loop header
LB: loop body
LE: loop exit
PB: predicated region body
PF: predicated region fallthrough
CT: control target
= control target key end

     0   :  { %s726_s9 = smov 0   ;;  %s784_s0 = inlined_call_operand.vmem [shape: bf16[384,128], index: 0, kind: input, shape index: {}]   ;;  %s785_s1 = inlined_call_operand.vmem [shape: bf16[128,128], index: 1, kind: input, shape index: {}]   ;;  %s786_s2 = inlined_call_operand.vmem [shape: bf16[384,128], index: 2, kind: output, shape index: {}]  }
   0x1 LB: > { %s509_s10 = sadd.s32 4294967295, %s709_s9   ;;  %p513_p0 = scmp.ge.s32.totalorder %s709_s9, 1  ;;  %s709_s9 = sphi %s726_s9, %s12_s9  }
   0x2   : > { %p113_p1 = scmp.lt.s32.totalorder %s709_s9, 4 }
   0x4   : > { %p114_p2 = pnand %p513_p0, %p113_p1 }
   0x5   : > { %s514_s13 = sshll.u32 (!%p114_p2), %s509_s10, 4 }
   0x6   : > { %117 = sbr.rel (%p114_p2) target bundleno = 254 (0xfe), region = 28  ;;  %p136_p3 = scmp.lt.s32.totalorder (!%p114_p2), %s514_s13, 47 }
   0xb   : > { %v687_v0 = vld [vmem:[%s785_s1 + $0x38] sm:$0xff]   ;;  %v688_v1 = vld [vmem:[%s785_s1 + $0x30] sm:$0xff]   ;;  %s788_s13 = smov (!%p136_p3, %s514_s13), 47  ;;  %v689_v2 = vld [vmem:[%s785_s1 + $0x28] sm:$0xff]  }
   0xc   : > { %631 = vmatprep.subr.bf16.mxu0 %v687_v0  ;;  %663 = vmatprep.subr.bf16.mxu1 %v687_v0  ;;  %s515_s18 = sshll.u32 %s788_s13, 2  ;;  %v690_v3 = vld [vmem:[%s785_s1 + $0x20] sm:$0xff]   ;;  %v691_v6 = vld [vmem:[%s785_s1 + $0x18] sm:$0xff]   ;;  %v692_v7 = vld [vmem:[%s785_s1 + $0x10] sm:$0xff]  }
   0xd   : > { %632 = vmatpush3.bf16.msra.mxu0 %v687_v0  ;;  %671 = vmatpush3.bf16.msra.mxu1 %v687_v0  ;;  %s751_s21 = scalar_lea.vmem %s784_s0, %s515_s18  ;;  %v693_v8 = vld [vmem:[%s785_s1 + $0x8] sm:$0xff]   ;;  %v694_v9 = vld [vmem:[%s785_s1] sm:$0xff]   ;;  %s145_s6 = scalar_lea.vmem %s786_s2, %s515_s18 }
   0xe   : > { %633 = vmatprep.subr.bf16.mxu0 %v688_v1  ;;  %664 = vmatprep.subr.bf16.mxu1 %v688_v1  ;;  %v695_v4 = vld [vmem:[%s751_s21] sm:$0xff]   ;;  %v697_v10 = vld [vmem:[%s751_s21 + $0x8] sm:$0xff]   ;;  %v699_v12 = vld [vmem:[%s751_s21 + $0x10] sm:$0xff]  }
   0xf   : > { %v696_v5 = vld [vmem:[%s751_s21 + $0x20] sm:$0xff]   ;;  %647 = vmatprep.mubr.bf16.mxu0 %v695_v4  ;;  %v698_v11 = vld [vmem:[%s751_s21 + $0x28] sm:$0xff]   ;;  %v700_v13 = vld [vmem:[%s751_s21 + $0x30] sm:$0xff]  }
  0x10   : > { %655 = vmatprep.mubr.bf16.mxu1 %v696_v5  ;;  %v701_v14 = vld [vmem:[%s751_s21 + $0x18] sm:$0xff]  }
  0x11   : > { %634 = vmatpush3.bf16.msra.mxu0 %v688_v1  ;;  %672 = vmatpush3.bf16.msra.mxu1 %v688_v1  ;;  %v702_v15 = vld [vmem:[%s751_s21 + $0x38] sm:$0xff]  }
  0x12   : > { %635 = vmatprep.subr.bf16.mxu0 %v689_v2  ;;  %665 = vmatprep.subr.bf16.mxu1 %v689_v2 }
  0x15   : > { %636 = vmatpush3.bf16.msra.mxu0 %v689_v2  ;;  %673 = vmatpush3.bf16.msra.mxu1 %v689_v2 }
  0x16   : > { %637 = vmatprep.subr.bf16.mxu0 %v690_v3  ;;  %666 = vmatprep.subr.bf16.mxu1 %v690_v3 }
  0x19   : > { %638 = vmatpush3.bf16.msra.mxu0 %v690_v3  ;;  %674 = vmatpush3.bf16.msra.mxu1 %v690_v3 }
  0x1a   : > { %639 = vmatprep.subr.bf16.mxu0 %v691_v6  ;;  %667 = vmatprep.subr.bf16.mxu1 %v691_v6 }
  0x1d   : > { %640 = vmatpush3.bf16.msra.mxu0 %v691_v6  ;;  %675 = vmatpush3.bf16.msra.mxu1 %v691_v6 }
  0x1e   : > { %641 = vmatprep.subr.bf16.mxu0 %v692_v7  ;;  %668 = vmatprep.subr.bf16.mxu1 %v692_v7 }
  0x21   : > { %642 = vmatpush3.bf16.msra.mxu0 %v692_v7  ;;  %676 = vmatpush3.bf16.msra.mxu1 %v692_v7 }
  0x22   : > { %643 = vmatprep.subr.bf16.mxu0 %v693_v8  ;;  %669 = vmatprep.subr.bf16.mxu1 %v693_v8 }
  0x25   : > { %644 = vmatpush3.bf16.msra.mxu0 %v693_v8  ;;  %677 = vmatpush3.bf16.msra.mxu1 %v693_v8 }
  0x26   : > { %645 = vmatprep.subr.bf16.mxu0 %v694_v9  ;;  %670 = vmatprep.subr.bf16.mxu1 %v694_v9 }
  0x29   : > { %646 = vmatpush3.bf16.msra.mxu0 %v694_v9  ;;  %678 = vmatpush3.bf16.msra.mxu1 %v694_v9 }
  0x2c   : > { %648 = vmatmul.mubr.bf16.vlgmr.msra.gmra.mxu0 %v697_v10  ;;  %656 = vmatmul.mubr.bf16.vlgmr.msra.gmra.mxu1 %v698_v11 }
  0x2d   : > { %651 = vmatprep.mubr.bf16.mxu0 %v699_v12  ;;  %659 = vmatprep.mubr.bf16.mxu1 %v700_v13 }
  0x34   : > { %652 = vmatmul.mubr.bf16.gmra.mxu0 %v701_v14  ;;  %660 = vmatmul.mubr.bf16.gmra.mxu1 %v702_v15 }
  0xec   : > { %v649_v16 = vpop.f32.mrf.mxu0  ;;  %v657_v17 = vpop.f32.mrf.mxu1 }
  0xee   : > { %v310_v18 = vpop.f32.mrf.mxu0  ;;  %v342_v19 = vpop.f32.mrf.mxu1 }
  0xf0   : > { %v650_v20 = vpop.f32.mrf.mxu0  ;;  %v658_v21 = vpop.f32.mrf.mxu1 }
  0xf1   : > { %v576_v22 = vpack.c.bf16 %v650_v20, %v649_v16  ;;  %v596_v23 = vpack.c.bf16 %v658_v21, %v657_v17 }
  0xf2   : > { %v313_v24 = vpop.f32.mrf.mxu0  ;;  %v345_v25 = vpop.f32.mrf.mxu1 }
  0xf3   : > { %608 = vst [vmem:[%s145_s6 + $0x8] sm:$0xff] %v576_v22   ;;  %612 = vst [vmem:[%s145_s6 + $0x28] sm:$0xff] %v596_v23   ;;  %v571_v26 = vpack.c.bf16 %v313_v24, %v310_v18  ;;  %v591_v27 = vpack.c.bf16 %v345_v25, %v342_v19 }
  0xf4   : > { %v653_v28 = vpop.f32.mrf.mxu0  ;;  %v661_v29 = vpop.f32.mrf.mxu1 }
  0xf5   : > { %572 = vst [vmem:[%s145_s6] sm:$0xff] %v571_v26   ;;  %611 = vst [vmem:[%s145_s6 + $0x20] sm:$0xff] %v591_v27  }
  0xf6   : > { %v326_v30 = vpop.f32.mrf.mxu0  ;;  %v358_v31 = vpop.f32.mrf.mxu1 }
  0xf8   : > { %v654_v32 = vpop.f32.mrf.mxu0  ;;  %v662_v33 = vpop.f32.mrf.mxu1 }
  0xf9   : > { %v586_v34 = vpack.c.bf16 %v654_v32, %v653_v28  ;;  %v606_v35 = vpack.c.bf16 %v662_v33, %v661_v29 }
  0xfa   : > { %v329_v36 = vpop.f32.mrf.mxu0  ;;  %v361_v37 = vpop.f32.mrf.mxu1 }
  0xfb   : > { %610 = vst [vmem:[%s145_s6 + $0x18] sm:$0xff] %v586_v34   ;;  %614 = vst [vmem:[%s145_s6 + $0x38] sm:$0xff] %v606_v35   ;;  %v581_v38 = vpack.c.bf16 %v329_v36, %v326_v30  ;;  %v601_v39 = vpack.c.bf16 %v361_v37, %v358_v31 }
  0xfd   : > { %609 = vst [vmem:[%s145_s6 + $0x10] sm:$0xff] %v581_v38   ;;  %613 = vst [vmem:[%s145_s6 + $0x30] sm:$0xff] %v601_v39  }
  0xfe PF: > { %s12_s9 = sadd.s32 1, %s709_s9  }
  0xff   : > { %p9_p4 = scmp.ge.s32.totalorder %s12_s9, 5  }
 0x101   :  { %11 = sbr.rel (!%p9_p4) target bundleno = 1 (0x1), region = 58 }

// kernel: gcn_forward.7
= control target key start
LH: loop header
LB: loop body
LE: loop exit
PB: predicated region body
PF: predicated region fallthrough
CT: control target
= control target key end

     0   :  { %s1407_s0 = inlined_call_operand.vmem [shape: s32[6], index: 0, kind: input, shape index: {}]   ;;  %s1408_s2 = inlined_call_operand.vmem [shape: bf16[384,384], index: 2, kind: input, shape index: {}]   ;;  %s1409_s3 = inlined_call_operand.vmem [shape: bf16[384,128], index: 3, kind: input, shape index: {}]   ;;  %s1410_s4 = inlined_call_operand.vmem [shape: f32[1,128], index: 4, kind: input, shape index: {}]   ;;  %s1411_s5 = inlined_call_operand.vmem [shape: bf16[384,128], index: 5, kind: output, shape index: {}]   ;;  %s1412_s1 = inlined_call_operand.vmem [shape: s32[3], index: 1, kind: input, shape index: {}]  }
   0x1   :  { %s10_s20 = sshll.u32 %s1407_s0, 4  ;;  %s14_s23 = sshll.u32 %s1412_s1, 4  ;;  %s11_s20 = int_to_ptr.vmem [resolvable:$true] %s10_s20  ;;  %s15_s23 = int_to_ptr.vmem [resolvable:$true] %s14_s23 }
   0x2   :  { %s1133_s24 = scalar_lea.vmem %s11_s20, 16  ;;  %p1138_p1 = scmp.lt.s32.totalorder %s11_s20, %s11_s20 }
   0x3   :  { %p1134_p0 = scmp.ne.s32.totalorder %s11_s20, %s1133_s24  ;;  %p1139_p2 = scmp.lt.s32.totalorder %s1133_s24, %s1133_s24 }
   0x5   :  { %p1140_p3 = por %p1139_p2, %p1138_p1 }
   0x7   :  { %p1141_p4 = pnand %p1140_p3, %p1134_p0 }
   0x9   :  { %1144 = shalt.err (!%p1141_p4)  }
   0xa   :  { %s1215_s25 = smov [#allocation4]   ;;  %s1145_s26 = scalar_lea.vmem %s15_s23, 16 }
   0xb   :  { %13 = dma.vmem_to_smem %s11_s20, 16, %s1215_s25, [#allocation3] }
   0xc   :  { %p1146_p5 = scmp.ne.s32.totalorder %s15_s23, %s1145_s26  ;;  %p1150_p6 = scmp.lt.s32.totalorder %s15_s23, %s15_s23 }
   0xd   :  { %p1151_p7 = scmp.lt.s32.totalorder %s1145_s26, %s1145_s26 }
   0xf   :  { %p1152_p8 = por %p1151_p7, %p1150_p6 }
  0x11   :  { %p1153_p9 = pnand %p1152_p8, %p1146_p5 }
  0x13   :  { %1156 = shalt.err (!%p1153_p9)  }
  0x14   :  { %s1216_s0 = smov [#allocation5]  }
  0x15   :  { %17 = dma.vmem_to_smem %s15_s23, 16, %s1216_s0, [#allocation3] }
  0x16   :  { %1185 = dma.done.wait [#allocation3], 32 }
  0x17   :  { %1186 = vsyncadd [#allocation3], 4294967264 }
  0x18   :  { %19 = sfence }
  0x19   :  { %s1254_s1 = smov 0   ;;  %s1256_s27 = smov 0  }
  0x1a   :  { %s1258_s28 = smov 0   ;;  %s1260_s29 = smov 0  }
  0x1b   :  { %s1262_s30 = smov 0   ;;  %s1264_s6 = smov 0  }
  0x1c   :  { %s1266_s7 = smov 0  }
  0x1d LB: > { %s34_s8 = sadd.s32 1, %s1205_s30  ;;  %s37_s9 = sadd.s32 1, %s1209_s6  ;;  %s1213_s7 = sphi %s1266_s7, %s25_s7   ;;  %s1209_s6 = sphi %s1264_s6, %s1418_s6   ;;  %s1205_s30 = sphi %s1262_s30, %s1417_s30   ;;  %s1201_s29 = sphi %s1260_s29, %s1416_s29   ;;  %s1197_s28 = sphi %s1258_s28, %s1415_s28   ;;  %s1193_s27 = sphi %s1256_s27, %s1414_s27   ;;  %s1189_s1 = sphi %s1254_s1, %s1413_s1  }
  0x1e   : > { %p35_p10 = scmp.ge.s32.totalorder %s34_s8, 2  ;;  %s873_s10 = sshll.u32 %s1209_s6, 1 }
  0x1f   : > { %s42_s11 = sadd.s32 %s1205_s30, %s873_s10  ;;  %p59_p11 = scmp.ne.s32.totalorder %s1193_s27, %s1189_s1 }
  0x20   : > { %s1420_s9 = smov (!%p35_p10, %s37_s9), %s1209_s6  ;;  %p60_p13 = scmp.eq.s32.totalorder %s1213_s7, 0 }
  0x21   : > { %p39_p12 = scmp.ge.s32.totalorder %s1420_s9, 3  ;;  %s1422_s8 = smov (%p35_p10, %s34_s8), 0 }
  0x22   : > { %p61_p0 = por %p60_p13, %p59_p11  ;;  %s43_s12 = sld [smem:[#allocation4 + %s42_s11]] }
  0x23   : > { %s1424_s9 = smov (%p39_p12, %s1420_s9), 0  ;;  %s52_s19 = sadd.s32 1, %s1193_s27 }
  0x24   : > { %s874_s13 = sshll.u32 %s1424_s9, 1  ;;  %s47_s16 = ssub.s32 %s1209_s6, %s1424_s9 }
  0x25   : > { %s45_s14 = sadd.s32 %s874_s13, %s1422_s8  ;;  %p878_p2 = scmp.ge.s32.totalorder %s1213_s7, 6 }
  0x26   : > { %s46_s15 = sld [smem:[#allocation4 + %s45_s14]] }
  0x2c   : > { %s48_s17 = ssub.s32 %s43_s12, %s46_s15  ;;  %167 = sbr.rel (%p878_p2) target bundleno = 69 (0x45), region = 20 }
  0x2d   : > { %s49_s18 = sor.u32 %s48_s17, %s47_s16 }
  0x2e   : > { %p50_p1 = scmp.eq.s32.totalorder %s49_s18, 0 }
  0x30   : > { %s1307_s20 = scalar_select %p50_p1, %s1193_s27, %s52_s19  }
  0x31   : > { %170 = sbr.rel (!%p61_p0) target bundleno = 69 (0x45), region = 24  ;;  %s177_s21 = sld [smem:[#allocation4 + %s42_s11]] (%p61_p0) }
  0x32   : > { %s172_s22 = sand.u32 (%p61_p0), 1, %s1193_s27   ;;  %s1057_s23 = smul.u32 (%p61_p0), 48, %s1209_s6 }
  0x33   : > { %s879_s24 = sshll.u32 (%p61_p0), %s172_s22, 6 }
  0x34   : > { %s174_s11 = scalar_lea.vmem (%p61_p0), [#allocation6], %s879_s24 }
  0x37   : > { %s180_s25 = sadd.s32 %s1057_s23, %s177_s21 }
  0x38   : > { %s883_s26 = sshll.u32 %s180_s25, 2 }
  0x39   : > { %s1315_s12 = scalar_lea.vmem %s1408_s2, %s883_s26 }
  0x3a   : > { %v199_v0 = vld [vmem:[%s1315_s12] sm:$0xf]  ;;  %v201_v1 = vld [vmem:[%s1315_s12 + $0xc] sm:$0xf]  ;;  %v203_v2 = vld [vmem:[%s1315_s12 + $0x18] sm:$0xf] }
  0x3b   : > { %200 = vst [vmem:[%s174_s11] sm:$0xf] %v199_v0  ;;  %202 = vst [vmem:[%s174_s11 + $0x4] sm:$0xf] %v201_v1  ;;  %v205_v3 = vld [vmem:[%s1315_s12 + $0x24] sm:$0xf] }
  0x3c   : > { %204 = vst [vmem:[%s174_s11 + $0x8] sm:$0xf] %v203_v2  ;;  %v207_v4 = vld [vmem:[%s1315_s12 + $0x30] sm:$0xf]  ;;  %v209_v5 = vld [vmem:[%s1315_s12 + $0x3c] sm:$0xf] }
  0x3d   : > { %206 = vst [vmem:[%s174_s11 + $0xc] sm:$0xf] %v205_v3  ;;  %208 = vst [vmem:[%s174_s11 + $0x10] sm:$0xf] %v207_v4  ;;  %v211_v6 = vld [vmem:[%s1315_s12 + $0x48] sm:$0xf] }
  0x3e   : > { %210 = vst [vmem:[%s174_s11 + $0x14] sm:$0xf] %v209_v5  ;;  %v213_v7 = vld [vmem:[%s1315_s12 + $0x54] sm:$0xf]  ;;  %v215_v8 = vld [vmem:[%s1315_s12 + $0x60] sm:$0xf] }
  0x3f   : > { %212 = vst [vmem:[%s174_s11 + $0x18] sm:$0xf] %v211_v6  ;;  %214 = vst [vmem:[%s174_s11 + $0x1c] sm:$0xf] %v213_v7  ;;  %v217_v9 = vld [vmem:[%s1315_s12 + $0x6c] sm:$0xf] }
  0x40   : > { %216 = vst [vmem:[%s174_s11 + $0x20] sm:$0xf] %v215_v8  ;;  %v219_v10 = vld [vmem:[%s1315_s12 + $0x78] sm:$0xf]  ;;  %v221_v11 = vld [vmem:[%s1315_s12 + $0x84] sm:$0xf] }
  0x41   : > { %218 = vst [vmem:[%s174_s11 + $0x24] sm:$0xf] %v217_v9  ;;  %220 = vst [vmem:[%s174_s11 + $0x28] sm:$0xf] %v219_v10  ;;  %v223_v12 = vld [vmem:[%s1315_s12 + $0x90] sm:$0xf] }
  0x42   : > { %222 = vst [vmem:[%s174_s11 + $0x2c] sm:$0xf] %v221_v11  ;;  %v225_v13 = vld [vmem:[%s1315_s12 + $0x9c] sm:$0xf]  ;;  %v227_v14 = vld [vmem:[%s1315_s12 + $0xa8] sm:$0xf] }
  0x43   : > { %224 = vst [vmem:[%s174_s11 + $0x30] sm:$0xf] %v223_v12  ;;  %226 = vst [vmem:[%s174_s11 + $0x34] sm:$0xf] %v225_v13  ;;  %v229_v15 = vld [vmem:[%s1315_s12 + $0xb4] sm:$0xf] }
  0x44   : > { %228 = vst [vmem:[%s174_s11 + $0x38] sm:$0xf] %v227_v14  ;;  %230 = vst [vmem:[%s174_s11 + $0x3c] sm:$0xf] %v229_v15 }
  0x45 PF: > { %p884_p3 = scmp.ge.s32.totalorder %s1213_s7, 1  ;;  %p300_p4 = scmp.lt.s32.totalorder %s1213_s7, 7 }
  0x47   : > { %p301_p5 = pnand %p884_p3, %p300_p4 }
  0x48   : > { %s307_s13 = sand.u32 (!%p301_p5), 1, %s1189_s1   ;;  %s886_s14 = sshll.u32 (!%p301_p5), %s1201_s29, 1 }
  0x49   : > { %304 = sbr.rel (%p301_p5) target bundleno = 366 (0x16e), region = 69  ;;  %s885_s15 = sshll.u32 (!%p301_p5), %s307_s13, 6 }
  0x4a   : > { %s343_s16 = sadd.s32 (!%p301_p5), %s1197_s28, %s886_s14  ;;  %s889_s18 = sshll.u32 (!%p301_p5), %s1201_s29, 4 }
  0x4b   : > { %s344_s17 = sld [smem:[#allocation4 + %s343_s16]] (!%p301_p5)  ;;  %p355_p6 = scmp.lt.s32.totalorder (!%p301_p5), %s889_s18, 47 }
  0x4c   : > { %s1340_s19 = sld [smem:[#allocation5 + %s1201_s29]] (!%p301_p5)  ;;  %s1352_s12 = scalar_lea.vmem (!%p301_p5), [#allocation6], %s885_s15 }
  0x4d   : > { %p891_p8 = scmp.ne.s32.totalorder (!%p301_p5), %s1197_s28, 0 }
  0x4e   : > { %s1426_s18 = smov (!%p355_p6, %s889_s18), 47 }
  0x4f   : > { %s890_s22 = sshll.u32 %s1426_s18, 2 }
  0x50   : > { %s1345_s25 = scalar_lea.vmem %s1411_s5, %s890_s22 }
  0x51   : > { %s887_s21 = sshll.u32 %s344_s17, 4 }
  0x52   : > { %p346_p7 = scmp.lt.s32.totalorder %s887_s21, 47  ;;  %365 = sbr.rel (%p891_p8) target bundleno = 96 (0x60), region = 77 }
  0x54   : > { %s1428_s21 = smov (!%p346_p7, %s887_s21), 47 }
  0x55   : > { %s888_s26 = sshll.u32 %s1428_s21, 2 }
  0x56   : > { %s1350_s10 = scalar_lea.vmem %s1409_s3, %s888_s26 }
  0x57   : > { %v1217_v16 = vmov 0.0  }
  0x58   : > { %366 = vst [vmem:[#allocation2 + $0x30] sm:$0xff] %v1217_v16  ;;  %367 = vst [vmem:[#allocation2] sm:$0xff] %v1217_v16 }
  0x59   : > { %368 = vst [vmem:[#allocation2 + $0x58] sm:$0xff] %v1217_v16  ;;  %369 = vst [vmem:[#allocation2 + $0x18] sm:$0xff] %v1217_v16 }
  0x5a   : > { %370 = vst [vmem:[#allocation2 + $0x50] sm:$0xff] %v1217_v16  ;;  %371 = vst [vmem:[#allocation2 + $0x68] sm:$0xff] %v1217_v16 }
  0x5b   : > { %372 = vst [vmem:[#allocation2 + $0x8] sm:$0xff] %v1217_v16  ;;  %373 = vst [vmem:[#allocation2 + $0x48] sm:$0xff] %v1217_v16 }
  0x5c   : > { %374 = vst [vmem:[#allocation2 + $0x40] sm:$0xff] %v1217_v16  ;;  %375 = vst [vmem:[#allocation2 + $0x20] sm:$0xff] %v1217_v16 }
  0x5d   : > { %376 = vst [vmem:[#allocation2 + $0x10] sm:$0xff] %v1217_v16  ;;  %377 = vst [vmem:[#allocation2 + $0x38] sm:$0xff] %v1217_v16 }
  0x5e   : > { %378 = vst [vmem:[#allocation2 + $0x60] sm:$0xff] %v1217_v16  ;;  %379 = vst [vmem:[#allocation2 + $0x70] sm:$0xff] %v1217_v16 }
  0x5f   : > { %380 = vst [vmem:[#allocation2 + $0x78] sm:$0xff] %v1217_v16  ;;  %381 = vst [vmem:[#allocation2 + $0x28] sm:$0xff] %v1217_v16 }
  0x60 PF: > { %p892_p9 = scmp.ge.s32.totalorder %s1197_s28, %s1340_s19 }
  0x62   : > { %385 = sbr.rel (%p892_p9) target bundleno = 346 (0x15a), region = 81 }
  0x67   : > { %v1117_v17 = vld [vmem:[%s1350_s10 + $0x38] sm:$0xff]   ;;  %v1118_v18 = vld [vmem:[%s1350_s10 + $0x30] sm:$0xff]   ;;  %v1119_v19 = vld [vmem:[%s1350_s10 + $0x28] sm:$0xff]  }
  0x68   : > { %1009 = vmatprep.subr.bf16.mxu0 %v1117_v17  ;;  %1041 = vmatprep.subr.bf16.mxu1 %v1117_v17  ;;  %v1120_v20 = vld [vmem:[%s1350_s10 + $0x20] sm:$0xff]   ;;  %v1121_v23 = vld [vmem:[%s1350_s10 + $0x18] sm:$0xff]   ;;  %v1122_v24 = vld [vmem:[%s1350_s10 + $0x10] sm:$0xff]  }
  0x69   : > { %1010 = vmatpush3.bf16.msra.mxu0 %v1117_v17  ;;  %1049 = vmatpush3.bf16.msra.mxu1 %v1117_v17  ;;  %v1125_v21 = vld [vmem:[%s1352_s12] sm:$0xff]   ;;  %v1123_v25 = vld [vmem:[%s1350_s10 + $0x8] sm:$0xff]   ;;  %v1129_v29 = vld [vmem:[%s1352_s12 + $0x10] sm:$0xff]  }
  0x6a   : > { %1011 = vmatprep.subr.bf16.mxu0 %v1118_v18  ;;  %1042 = vmatprep.subr.bf16.mxu1 %v1118_v18  ;;  %v1126_v22 = vld [vmem:[%s1352_s12 + $0x20] sm:$0xff]   ;;  %v1127_v27 = vld [vmem:[%s1352_s12 + $0x8] sm:$0xff]   ;;  %v1130_v30 = vld [vmem:[%s1352_s12 + $0x30] sm:$0xff]  }
  0x6b   : > { %1025 = vmatprep.mubr.bf16.mxu0 %v1125_v21  ;;  %1033 = vmatprep.mubr.bf16.mxu1 %v1126_v22  ;;  %v1124_v26 = vld [vmem:[%s1350_s10] sm:$0xff]   ;;  %v1128_v28 = vld [vmem:[%s1352_s12 + $0x28] sm:$0xff]   ;;  %v1131_v31 = vld [vmem:[%s1352_s12 + $0x18] sm:$0xff]  }
  0x6c   : > { %v1132_v32 = vld [vmem:[%s1352_s12 + $0x38] sm:$0xff]   ;;  %v396_v34 = vld [vmem:[#allocation2 + $0x10] sm:$0xff]  ;;  %v394_v38 = vld [vmem:[#allocation2 + $0x40] sm:$0xff] }
  0x6d   : > { %1012 = vmatpush3.bf16.msra.mxu0 %v1118_v18  ;;  %1050 = vmatpush3.bf16.msra.mxu1 %v1118_v18  ;;  %v388_v33 = vld [vmem:[#allocation2 + $0x58] sm:$0xff]  ;;  %v386_v37 = vld [vmem:[#allocation2 + $0x30] sm:$0xff]  ;;  %v387_v49 = vld [vmem:[#allocation2] sm:$0xff] }
  0x6e   : > { %1013 = vmatprep.subr.bf16.mxu0 %v1119_v19  ;;  %1043 = vmatprep.subr.bf16.mxu1 %v1119_v19  ;;  %v389_v43 = vld [vmem:[#allocation2 + $0x18] sm:$0xff]  ;;  %v395_v50 = vld [vmem:[#allocation2 + $0x20] sm:$0xff]  ;;  %v392_v55 = vld [vmem:[#allocation2 + $0x8] sm:$0xff] }
  0x6f   : > { %v397_v44 = vld [vmem:[#allocation2 + $0x38] sm:$0xff]  ;;  %v390_v61 = vld [vmem:[#allocation2 + $0x50] sm:$0xff]  ;;  %v398_v62 = vld [vmem:[#allocation2 + $0x60] sm:$0xff] }
  0x70   : > { %v400_v56 = vld [vmem:[#allocation2 + $0x78] sm:$0xff]  ;;  %v393_v3 = vld [vmem:[#allocation2 + $0x48] sm:$0xff]  ;;  %v399_v10 = vld [vmem:[#allocation2 + $0x70] sm:$0xff] }
  0x71   : > { %1014 = vmatpush3.bf16.msra.mxu0 %v1119_v19  ;;  %1051 = vmatpush3.bf16.msra.mxu1 %v1119_v19  ;;  %v401_v4 = vld [vmem:[#allocation2 + $0x28] sm:$0xff] }
  0x72   : > { %1015 = vmatprep.subr.bf16.mxu0 %v1120_v20  ;;  %1044 = vmatprep.subr.bf16.mxu1 %v1120_v20  ;;  %v391_v9 = vld [vmem:[#allocation2 + $0x68] sm:$0xff] }
  0x75   : > { %1016 = vmatpush3.bf16.msra.mxu0 %v1120_v20  ;;  %1052 = vmatpush3.bf16.msra.mxu1 %v1120_v20 }
  0x76   : > { %1017 = vmatprep.subr.bf16.mxu0 %v1121_v23  ;;  %1045 = vmatprep.subr.bf16.mxu1 %v1121_v23 }
  0x79   : > { %1018 = vmatpush3.bf16.msra.mxu0 %v1121_v23  ;;  %1053 = vmatpush3.bf16.msra.mxu1 %v1121_v23 }
  0x7a   : > { %1019 = vmatprep.subr.bf16.mxu0 %v1122_v24  ;;  %1046 = vmatprep.subr.bf16.mxu1 %v1122_v24 }
  0x7d   : > { %1020 = vmatpush3.bf16.msra.mxu0 %v1122_v24  ;;  %1054 = vmatpush3.bf16.msra.mxu1 %v1122_v24 }
  0x7e   : > { %1021 = vmatprep.subr.bf16.mxu0 %v1123_v25  ;;  %1047 = vmatprep.subr.bf16.mxu1 %v1123_v25 }
  0x81   : > { %1022 = vmatpush3.bf16.msra.mxu0 %v1123_v25  ;;  %1055 = vmatpush3.bf16.msra.mxu1 %v1123_v25 }
  0x82   : > { %1023 = vmatprep.subr.bf16.mxu0 %v1124_v26  ;;  %1048 = vmatprep.subr.bf16.mxu1 %v1124_v26 }
  0x85   : > { %1024 = vmatpush3.bf16.msra.mxu0 %v1124_v26  ;;  %1056 = vmatpush3.bf16.msra.mxu1 %v1124_v26 }
  0x88   : > { %1026 = vmatmul.mubr.bf16.vlgmr.msra.gmra.mxu0 %v1127_v27  ;;  %1034 = vmatmul.mubr.bf16.vlgmr.msra.gmra.mxu1 %v1128_v28 }
  0x89   : > { %1029 = vmatprep.mubr.bf16.mxu0 %v1129_v29  ;;  %1037 = vmatprep.mubr.bf16.mxu1 %v1130_v30 }
  0x90   : > { %1030 = vmatmul.mubr.bf16.gmra.mxu0 %v1131_v31  ;;  %1038 = vmatmul.mubr.bf16.gmra.mxu1 %v1132_v32 }
 0x148   : > { %v1027_v35 = vpop.f32.mrf.mxu0  ;;  %v1035_v36 = vpop.f32.mrf.mxu1 }
 0x149   : > { %v629_v39 = vadd.f32 %v1027_v35, %v388_v33  ;;  %v637_v40 = vadd.f32 %v1035_v36, %v396_v34 }
 0x14a   : > { %v564_v41 = vpop.f32.mrf.mxu0  ;;  %v596_v42 = vpop.f32.mrf.mxu1 }
 0x14b   : > { %645 = vst [vmem:[#allocation2 + $0x58] sm:$0xff] %v629_v39  ;;  %653 = vst [vmem:[#allocation2 + $0x10] sm:$0xff] %v637_v40  ;;  %v627_v45 = vadd.f32 %v564_v41, %v386_v37  ;;  %v635_v46 = vadd.f32 %v596_v42, %v394_v38 }
 0x14c   : > { %v1028_v47 = vpop.f32.mrf.mxu0  ;;  %v1036_v48 = vpop.f32.mrf.mxu1 }
 0x14d   : > { %643 = vst [vmem:[#allocation2 + $0x30] sm:$0xff] %v627_v45  ;;  %651 = vst [vmem:[#allocation2 + $0x40] sm:$0xff] %v635_v46  ;;  %v630_v51 = vadd.f32 %v1028_v47, %v389_v43  ;;  %v638_v52 = vadd.f32 %v1036_v48, %v397_v44 }
 0x14e   : > { %v567_v53 = vpop.f32.mrf.mxu0  ;;  %v599_v54 = vpop.f32.mrf.mxu1 }
 0x14f   : > { %646 = vst [vmem:[#allocation2 + $0x18] sm:$0xff] %v630_v51  ;;  %654 = vst [vmem:[#allocation2 + $0x38] sm:$0xff] %v638_v52  ;;  %v628_v57 = vadd.f32 %v567_v53, %v387_v49  ;;  %v636_v58 = vadd.f32 %v599_v54, %v395_v50 }
 0x150   : > { %v1031_v59 = vpop.f32.mrf.mxu0  ;;  %v1039_v60 = vpop.f32.mrf.mxu1 }
 0x151   : > { %644 = vst [vmem:[#allocation2] sm:$0xff] %v628_v57  ;;  %652 = vst [vmem:[#allocation2 + $0x20] sm:$0xff] %v636_v58  ;;  %v633_v63 = vadd.f32 %v1031_v59, %v392_v55  ;;  %v641_v0 = vadd.f32 %v1039_v60, %v400_v56 }
 0x152   : > { %v580_v1 = vpop.f32.mrf.mxu0  ;;  %v612_v2 = vpop.f32.mrf.mxu1 }
 0x153   : > { %649 = vst [vmem:[#allocation2 + $0x8] sm:$0xff] %v633_v63  ;;  %657 = vst [vmem:[#allocation2 + $0x78] sm:$0xff] %v641_v0  ;;  %v631_v5 = vadd.f32 %v580_v1, %v390_v61  ;;  %v639_v6 = vadd.f32 %v612_v2, %v398_v62 }
 0x154   : > { %v1032_v7 = vpop.f32.mrf.mxu0  ;;  %v1040_v8 = vpop.f32.mrf.mxu1 }
 0x155   : > { %647 = vst [vmem:[#allocation2 + $0x50] sm:$0xff] %v631_v5  ;;  %655 = vst [vmem:[#allocation2 + $0x60] sm:$0xff] %v639_v6  ;;  %v634_v11 = vadd.f32 %v1032_v7, %v393_v3  ;;  %v642_v12 = vadd.f32 %v1040_v8, %v401_v4 }
 0x156   : > { %v583_v13 = vpop.f32.mrf.mxu0  ;;  %v615_v14 = vpop.f32.mrf.mxu1 }
 0x157   : > { %650 = vst [vmem:[#allocation2 + $0x48] sm:$0xff] %v634_v11  ;;  %658 = vst [vmem:[#allocation2 + $0x28] sm:$0xff] %v642_v12  ;;  %v632_v15 = vadd.f32 %v583_v13, %v391_v9  ;;  %v640_v16 = vadd.f32 %v615_v14, %v399_v10 }
 0x159   : > { %648 = vst [vmem:[#allocation2 + $0x68] sm:$0xff] %v632_v15  ;;  %656 = vst [vmem:[#allocation2 + $0x70] sm:$0xff] %v640_v16 }
 0x15a PF: > { %s909_s29 = sadd.s32 4294967295, %s1340_s19 }
 0x15b   : > { %p910_p10 = scmp.ne.s32.totalorder %s1197_s28, %s909_s29 }
 0x15d   : > { %663 = sbr.rel (%p910_p10) target bundleno = 366 (0x16e), region = 85 }
 0x162   : > { %v664_v17 = vld [vmem:[#allocation2 + $0x30] sm:$0xff]  ;;  %v665_v18 = vld [vmem:[#allocation2] sm:$0xff]  ;;  %v666_v22 = vld [vmem:[#allocation2 + $0x58] sm:$0xff] }
 0x163   : > { %v911_v19 = vld [vmem:[%s1410_s4] ss:$0 sm:$0xff]  ;;  %v667_v23 = vld [vmem:[#allocation2 + $0x18] sm:$0xff]  ;;  %v668_v24 = vld [vmem:[#allocation2 + $0x50] sm:$0xff] }
 0x164   : > { %v687_v20 = vadd.f32 %v911_v19, %v664_v17  ;;  %v688_v21 = vadd.f32 %v911_v19, %v665_v18  ;;  %v689_v25 = vadd.f32 %v911_v19, %v666_v22  ;;  %v690_v26 = vadd.f32 %v911_v19, %v667_v23  ;;  %v669_v27 = vld [vmem:[#allocation2 + $0x68] sm:$0xff]  ;;  %v672_v35 = vld [vmem:[#allocation2 + $0x40] sm:$0xff]  ;;  %v674_v37 = vld [vmem:[#allocation2 + $0x10] sm:$0xff] }
 0x165   : > { %v691_v28 = vadd.f32 %v911_v19, %v668_v24  ;;  %v670_v29 = vld [vmem:[#allocation2 + $0x8] sm:$0xff]  ;;  %v692_v32 = vadd.f32 %v911_v19, %v669_v27  ;;  %v673_v36 = vld [vmem:[#allocation2 + $0x20] sm:$0xff]  ;;  %v695_v39 = vadd.f32 %v911_v19, %v672_v35  ;;  %v675_v41 = vld [vmem:[#allocation2 + $0x38] sm:$0xff]  ;;  %v697_v42 = vadd.f32 %v911_v19, %v674_v37 }
 0x166   : > { %v671_v30 = vld [vmem:[#allocation2 + $0x48] sm:$0xff]  ;;  %v949_v31 = vpack.c.bf16 %v688_v21, %v687_v20  ;;  %v693_v33 = vadd.f32 %v911_v19, %v670_v29  ;;  %v954_v38 = vpack.c.bf16 %v690_v26, %v689_v25  ;;  %v696_v40 = vadd.f32 %v911_v19, %v673_v36  ;;  %v676_v43 = vld [vmem:[#allocation2 + $0x60] sm:$0xff]  ;;  %v677_v44 = vld [vmem:[#allocation2 + $0x70] sm:$0xff] }
 0x167   : > { %v694_v34 = vadd.f32 %v911_v19, %v671_v30  ;;  %v959_v45 = vpack.c.bf16 %v692_v32, %v691_v28  ;;  %v698_v47 = vadd.f32 %v911_v19, %v675_v41  ;;  %v699_v48 = vadd.f32 %v911_v19, %v676_v43  ;;  %v678_v49 = vld [vmem:[#allocation2 + $0x78] sm:$0xff]  ;;  %v679_v50 = vld [vmem:[#allocation2 + $0x28] sm:$0xff] }
 0x168   : > { %950 = vst [vmem:[%s1345_s25] sm:$0xff] %v949_v31   ;;  %986 = vst [vmem:[%s1345_s25 + $0x8] sm:$0xff] %v954_v38   ;;  %v969_v51 = vpack.c.bf16 %v696_v40, %v695_v39  ;;  %v700_v52 = vadd.f32 %v911_v19, %v677_v44  ;;  %v701_v53 = vadd.f32 %v911_v19, %v678_v49 }
 0x169   : > { %v964_v46 = vpack.c.bf16 %v694_v34, %v693_v33  ;;  %v702_v54 = vadd.f32 %v911_v19, %v679_v50  ;;  %987 = vst [vmem:[%s1345_s25 + $0x10] sm:$0xff] %v959_v45   ;;  %v974_v55 = vpack.c.bf16 %v698_v47, %v697_v42 }
 0x16a   : > { %989 = vst [vmem:[%s1345_s25 + $0x20] sm:$0xff] %v969_v51   ;;  %v979_v56 = vpack.c.bf16 %v700_v52, %v699_v48 }
 0x16b   : > { %988 = vst [vmem:[%s1345_s25 + $0x18] sm:$0xff] %v964_v46   ;;  %v984_v57 = vpack.c.bf16 %v702_v54, %v701_v53  ;;  %990 = vst [vmem:[%s1345_s25 + $0x28] sm:$0xff] %v974_v55  }
 0x16c   : > { %991 = vst [vmem:[%s1345_s25 + $0x30] sm:$0xff] %v979_v56  }
 0x16d   : > { %992 = vst [vmem:[%s1345_s25 + $0x38] sm:$0xff] %v984_v57  }
 0x16e PF: > { %s25_s7 = sadd.s32 1, %s1213_s7   ;;  %s1413_s1 = smov %s1193_s27 }
 0x16f   : > { %p22_p11 = scmp.ge.s32.totalorder %s25_s7, 8   ;;  %s1414_s27 = smov %s1307_s20 }
 0x170   : > { %s1415_s28 = smov %s1205_s30  ;;  %s1416_s29 = smov %s1209_s6 }
 0x171   : > { %s1417_s30 = smov %s1422_s8  ;;  %s1418_s6 = smov %s1424_s9 }
 0x172   :  { %24 = sbr.rel (!%p22_p11) target bundleno = 29 (0x1d), region = 123 }

</bundles_post_ra>
